<compile_context>
chip_gen: v7x
topology: tpu7x:2x2x1
jax: 0.10.0
libtpu: 0.0.40
codegen_flags: <defaults>
</compile_context>

<pallas_src>
import math
import functools

import jax
import jax.numpy as jnp
from jax.experimental import pallas as pl
from jax.experimental.pallas import tpu as pltpu

LN_EPS = 1e-5
_MIB = 1024 * 1024


# --------------------------- hardware-aware helpers -----------------------------

@functools.lru_cache(maxsize=None)
def _vmem_capacity_bytes():
    # Generation-aware VMEM budget (v5e/v6e: 128 MiB, v7x: 64 MiB).
    try:
        return int(pltpu.get_tpu_info().vmem_capacity_bytes)
    except Exception:
        return 64 * _MIB  # conservative default (v7x)


def _vmem_limit(block_bytes):
    cap = int(_vmem_capacity_bytes() * 0.75)          # leave headroom (esp. v7x)
    return int(min(max(2 * int(block_bytes) + 2 * _MIB, 4 * _MIB), cap))


def _row_tile(m, bytes_per_row):
    # Largest row tile (multiple of 8) dividing m that fits a per-row VMEM budget.
    budget = max(_vmem_capacity_bytes() // 4, 2 * _MIB)
    for t in (1024, 512, 256, 128, 64, 32, 16, 8):
        if m % t == 0 and t * bytes_per_row * 3 <= budget:
            return t
    return m


def _ff_tile(fd):
    # Lane-aligned tile of the feed-forward (reduction) dimension.
    for t in (512, 1024, 256, 2048, 128):
        if fd % t == 0:
            return t
    return fd


def _probe_kernel(a_ref, b_ref, c_ref, o_ref):
    o_ref[...] = a_ref[...] + b_ref[...] + c_ref[0]


@functools.lru_cache(maxsize=None)
def _single_buffer_ok():
    # Probe pipeline_mode=pl.Buffered(1) support once; fall back to default buffering.
    try:
        with jax.ensure_compile_time_eval():
            a = jnp.zeros((16, 128), jnp.float32)
            b = jnp.zeros((8, 128), jnp.float32)
            c = jnp.zeros((2, 8, 128), jnp.float32)
            y = pl.pallas_call(
                _probe_kernel,
                grid=(2,),
                in_specs=[
                    pl.BlockSpec((8, 128), lambda i: (i, 0)),
                    pl.BlockSpec((8, 128), lambda i: (0, 0),
                                 pipeline_mode=pl.Buffered(1)),
                    pl.BlockSpec((2, 8, 128), lambda i: (0, 0, 0),
                                 pipeline_mode=pl.Buffered(1)),
                ],
                out_specs=pl.BlockSpec((8, 128), lambda i: (i, 0)),
                out_shape=jax.ShapeDtypeStruct((16, 128), jnp.float32),
            )(a, b, c)
            jax.block_until_ready(y)
        return True
    except Exception:
        return False


def _const_spec(shape, index_map):
    # BlockSpec for grid-invariant blocks (weights/biases): single-buffered when supported.
    if _single_buffer_ok():
        return pl.BlockSpec(shape, index_map, pipeline_mode=pl.Buffered(1))
    return pl.BlockSpec(shape, index_map)


# --------------------------- in-kernel math helpers -----------------------------

def _layernorm(x, g, b, eps):
    mean = jnp.mean(x, axis=-1, keepdims=True)
    xc = x - mean
    var = jnp.mean(xc * xc, axis=-1, keepdims=True)
    return xc * jax.lax.rsqrt(var + eps) * g + b


def _erf(x):
    # Abramowitz & Stegun 7.1.26, |err| <= 1.5e-7.
    # TODO(synk): switch to jax.lax.erf if/when Mosaic lowers erf_p inside Pallas kernels.
    a1, a2, a3, a4, a5 = 0.254829592, -0.284496736, 1.421413741, -1.453152027, 1.061405429
    p = 0.3275911
    sgn = jnp.where(x >= 0.0, 1.0, -1.0)
    z = jnp.abs(x)
    t = 1.0 / (1.0 + p * z)
    poly = ((((a5 * t + a4) * t + a3) * t + a2) * t + a1) * t
    return sgn * (1.0 - poly * jnp.exp(-z * z))


def _gelu_exact(x):
    return 0.5 * x * (1.0 + _erf(x * (1.0 / math.sqrt(2.0))))


# ----------------------------- Pallas kernels ------------------------------

def _attn_block_kernel(xq_ref, kv_ref, wq_ref, bq_ref, wkv_ref, bkv_ref,
                       wo_ref, bo_ref, g_ref, be_ref, o_ref, k_scr, v_scr,
                       *, num_heads, eps):
    # Fused: head-batched Q/K/V projections -> softmax(QK^T)V -> single full-E output
    # projection -> residual -> LayerNorm.  Grid = (batch, query-tile).
    h = num_heads
    xq = xq_ref[0]                                            # [tq, E]  bf16
    e = xq.shape[-1]

    # KV projection: computed once per batch element (query-tile 0), kept in VMEM scratch.
    @pl.when(pl.program_id(1) == 0)
    def _():
        kv = kv_ref[0]                                        # [Skv, E] bf16
        skv = kv.shape[0]
        kvb = jnp.broadcast_to(kv[None], (2 * h, skv, e))
        kvp = jax.lax.dot_general(kvb, wkv_ref[...], (((2,), (1,)), ((0,), (0,))),
                                  preferred_element_type=jnp.float32) + bkv_ref[...]
        k_scr[...] = kvp[:h].astype(k_scr.dtype)
        v_scr[...] = kvp[h:].astype(v_scr.dtype)

    # Q projection (1/sqrt(Dh) folded into wq/bq), head-batched.
    xqb = jnp.broadcast_to(xq[None], (h,) + xq.shape)
    q = (jax.lax.dot_general(xqb, wq_ref[...], (((2,), (1,)), ((0,), (0,))),
                             preferred_element_type=jnp.float32)
         + bq_ref[...]).astype(jnp.bfloat16)                   # [H, tq, Dh]

    k = k_scr[...]
    v = v_scr[...]
    s = jax.lax.dot_general(q, k, (((2,), (2,)), ((0,), (0,))),
                            preferred_element_type=jnp.float32)        # [H, tq, Skv]
    s = s - jnp.max(s, axis=-1, keepdims=True)
    p = jnp.exp(s)
    p = p * pl.reciprocal(jnp.sum(p, axis=-1, keepdims=True), approx=True)
    o = jax.lax.dot_general(p.astype(jnp.bfloat16), v, (((2,), (1,)), ((0,), (0,))),
                            preferred_element_type=jnp.float32)        # [H, tq, Dh]

    # Heads concatenated along lanes -> ONE [tq,E]@[E,E] output projection on the MXU.
    o_cat = jnp.concatenate([o[i] for i in range(h)], axis=-1).astype(jnp.bfloat16)
    attn = jnp.dot(o_cat, wo_ref[...], preferred_element_type=jnp.float32) + bo_ref[...]
    y = xq.astype(jnp.float32) + attn
    o_ref[0] = _layernorm(y, g_ref[...], be_ref[...], eps).astype(o_ref.dtype)


def _ffn_block_kernel(x_ref, w1_ref, b1_ref, w2_ref, b2_ref, g1_ref, nb1_ref,
                      g2_ref, nb2_ref, o_ref, acc_ref, *, eps, extra_norm):
    # Fused: linear1 -> exact GELU -> linear2 (Fd-tiled reduction into f32 accumulator)
    # -> residual -> LayerNorm [-> fused stack-final LayerNorm for the last layer].
    f = pl.program_id(1)

    @pl.when(f == 0)
    def _():
        acc_ref[...] = jnp.zeros_like(acc_ref)

    x = x_ref[...]                                            # [tm, E] bf16
    hcol = jnp.dot(x, w1_ref[...], preferred_element_type=jnp.float32) + b1_ref[...]
    hcol = _gelu_exact(hcol).astype(jnp.bfloat16)
    acc_ref[...] += jnp.dot(hcol, w2_ref[...], preferred_element_type=jnp.float32)

    @pl.when(f == pl.num_programs(1) - 1)
    def _():
        y = x.astype(jnp.float32) + acc_ref[...] + b2_ref[...]
        y = _layernorm(y, g1_ref[...], nb1_ref[...], eps)
        if extra_norm:
            y = _layernorm(y, g2_ref[...], nb2_ref[...], eps)
        o_ref[...] = y.astype(o_ref.dtype)


def _proj_softmax_kernel(x_ref, w_ref, b_ref, o_ref):
    # Fused output projection + eval-mode softmax (logits never hit HBM).
    logits = jnp.dot(x_ref[...], w_ref[...],
                     preferred_element_type=jnp.float32) + b_ref[...]
    m = jnp.max(logits, axis=-1, keepdims=True)
    p = jnp.exp(logits - m)
    o_ref[...] = (p / jnp.sum(p, axis=-1, keepdims=True)).astype(o_ref.dtype)


# ----------------------------- kernel wrappers ------------------------------

def _prep_attn_params(p, num_heads):
    # Reorganize packed [E,3E] in-proj weights into head-major [H,E,Dh] blocks (constant-
    # folded under jit) and fold the attention scale into Wq / bq.
    e = p["w_out"].shape[0]
    dh = e // num_heads
    scale = 1.0 / math.sqrt(dh)
    w_in = p["w_in"].astype(jnp.float32)
    b_in = p["b_in"].astype(jnp.float32)

    def split_heads(w, b, s):
        wh = (w * s).reshape(e, num_heads, dh).transpose(1, 0, 2)     # [H, E, Dh]
        bh = (b * s).reshape(num_heads, dh)[:, None, :]               # [H, 1, Dh]
        return wh, bh

    wq, bq = split_heads(w_in[:, :e], b_in[:e], scale)
    wk, bk = split_heads(w_in[:, e:2 * e], b_in[e:2 * e], 1.0)
    wv, bv = split_heads(w_in[:, 2 * e:], b_in[2 * e:], 1.0)
    wkv = jnp.concatenate([wk, wv], axis=0)                           # [2H, E, Dh]
    bkv = jnp.concatenate([bk, bv], axis=0)                           # [2H, 1, Dh]
    return (wq.astype(jnp.bfloat16), bq, wkv.astype(jnp.bfloat16), bkv,
            p["w_out"].astype(jnp.bfloat16),
            p["b_out"].reshape(1, e).astype(jnp.float32))


def pl_attn_block(x_q, x_kv, p, nw, nb, num_heads, eps=LN_EPS):
    # Self-attention when x_kv is x_q; cross-attention when x_kv is the encoder memory.
    B, Sq, E = x_q.shape
    Skv = x_kv.shape[1]
    dh = E // num_heads
    wq, bq, wkv, bkv, wo, bo = _prep_attn_params(p, num_heads)

    tq = _row_tile(Sq, bytes_per_row=12 * E + 4 * num_heads * Skv)
    nq = Sq // tq

    blk_bytes = (tq * E * 2 + Skv * E * 2 + 3 * E * E * 2 + E * E * 2
                 + 2 * num_heads * Skv * dh * 2 + tq * E * 2 + 16 * E * 4)
    ce = pl.CostEstimate(
        flops=int(B * (4 * Sq * E * E + 4 * Skv * E * E + 4 * Sq * Skv * E)),
        transcendentals=int(B * num_heads * Sq * Skv),
        bytes_accessed=int(2 * B * (2 * Sq + Skv) * E + 8 * E * E + 32 * E))

    kern = functools.partial(_attn_block_kernel, num_heads=num_heads, eps=eps)
    return pl.pallas_call(
        kern,
        grid=(B, nq),
        in_specs=[
            pl.BlockSpec((1, tq, E), lambda b, q: (b, q, 0)),
            pl.BlockSpec((1, Skv, E), lambda b, q: (b, 0, 0)),
            _const_spec((num_heads, E, dh), lambda b, q: (0, 0, 0)),
            _const_spec((num_heads, 1, dh), lambda b, q: (0, 0, 0)),
            _const_spec((2 * num_heads, E, dh), lambda b, q: (0, 0, 0)),
            _const_spec((2 * num_heads, 1, dh), lambda b, q: (0, 0, 0)),
            _const_spec((E, E), lambda b, q: (0, 0)),
            _const_spec((1, E), lambda b, q: (0, 0)),
            _const_spec((1, E), lambda b, q: (0, 0)),
            _const_spec((1, E), lambda b, q: (0, 0)),
        ],
        out_specs=pl.BlockSpec((1, tq, E), lambda b, q: (b, q, 0)),
        out_shape=jax.ShapeDtypeStruct((B, Sq, E), jnp.bfloat16),
        scratch_shapes=[pltpu.VMEM((num_heads, Skv, dh), jnp.bfloat16),
                        pltpu.VMEM((num_heads, Skv, dh), jnp.bfloat16)],
        compiler_params=pltpu.CompilerParams(
            dimension_semantics=("parallel", "arbitrary"),
            vmem_limit_bytes=_vmem_limit(blk_bytes)),
        cost_estimate=ce,
    )(x_q, x_kv, wq, bq, wkv, bkv, wo, bo,
      nw.reshape(1, E).astype(jnp.float32), nb.reshape(1, E).astype(jnp.float32))


def pl_ffn_block(x, p, nw, nb, extra_norm=None, eps=LN_EPS):
    B, S, E = x.shape
    Fd = p["ff_w1"].shape[1]
    M = B * S
    tf = _ff_tile(Fd)
    tm = _row_tile(M, bytes_per_row=10 * E + 6 * tf)
    x2 = x.reshape(M, E)

    has_extra = extra_norm is not None
    g2, nb2 = extra_norm if has_extra else (nw, nb)

    w1 = p["ff_w1"].astype(jnp.bfloat16)
    w2 = p["ff_w2"].astype(jnp.bfloat16)
    b1 = p["ff_b1"].reshape(1, Fd).astype(jnp.float32)
    b2 = p["ff_b2"].reshape(1, E).astype(jnp.float32)

    blk_bytes = (tm * E * 2 + E * tf * 2 + tf * E * 2 + tm * E * 4 + tm * E * 2
                 + tf * 4 + 6 * E * 4)
    ce = pl.CostEstimate(flops=int(4 * M * E * Fd), transcendentals=int(2 * M * Fd),
                         bytes_accessed=int(4 * M * E + 4 * E * Fd + 4 * Fd + 24 * E))

    kern = functools.partial(_ffn_block_kernel, eps=eps, extra_norm=has_extra)
    y = pl.pallas_call(
        kern,
        grid=(M // tm, Fd // tf),
        in_specs=[
            pl.BlockSpec((tm, E), lambda i, f: (i, 0)),
            pl.BlockSpec((E, tf), lambda i, f: (0, f)),
            pl.BlockSpec((1, tf), lambda i, f: (0, f)),
            pl.BlockSpec((tf, E), lambda i, f: (f, 0)),
            _const_spec((1, E), lambda i, f: (0, 0)),
            _const_spec((1, E), lambda i, f: (0, 0)),
            _const_spec((1, E), lambda i, f: (0, 0)),
            _const_spec((1, E), lambda i, f: (0, 0)),
            _const_spec((1, E), lambda i, f: (0, 0)),
        ],
        out_specs=pl.BlockSpec((tm, E), lambda i, f: (i, 0)),
        out_shape=jax.ShapeDtypeStruct((M, E), jnp.bfloat16),
        scratch_shapes=[pltpu.VMEM((tm, E), jnp.float32)],
        compiler_params=pltpu.CompilerParams(
            dimension_semantics=("parallel", "arbitrary"),
            vmem_limit_bytes=_vmem_limit(blk_bytes)),
        cost_estimate=ce,
    )(x2, w1, b1, w2, b2,
      nw.reshape(1, E).astype(jnp.float32), nb.reshape(1, E).astype(jnp.float32),
      g2.reshape(1, E).astype(jnp.float32), nb2.reshape(1, E).astype(jnp.float32))
    return y.reshape(B, S, E)


def pl_proj_softmax(x, w, b):
    # TODO(synk): for large vocabularies, switch to a V-tiled online-softmax variant.
    B, S, E = x.shape
    V = w.shape[1]
    M = B * S
    tm = _row_tile(M, bytes_per_row=2 * E + 8 * V)
    x2 = x.reshape(M, E)

    blk_bytes = tm * E * 2 + E * V * 2 + V * 4 + tm * V * 4
    ce = pl.CostEstimate(flops=int(2 * M * E * V), transcendentals=int(M * V),
                         bytes_accessed=int(2 * M * E + 2 * E * V + 4 * V + 4 * M * V))

    probs = pl.pallas_call(
        _proj_softmax_kernel,
        grid=(M // tm,),
        in_specs=[pl.BlockSpec((tm, E), lambda i: (i, 0)),
                  _const_spec((E, V), lambda i: (0, 0)),
                  _const_spec((1, V), lambda i: (0, 0))],
        out_specs=pl.BlockSpec((tm, V), lambda i: (i, 0)),
        out_shape=jax.ShapeDtypeStruct((M, V), jnp.float32),
        compiler_params=pltpu.CompilerParams(
            dimension_semantics=("parallel",),
            vmem_limit_bytes=_vmem_limit(blk_bytes)),
        cost_estimate=ce,
    )(x2, w.astype(jnp.bfloat16), b.reshape(1, V).astype(jnp.float32))
    return probs.reshape(B, S, V)


# ----------------------------- model pieces ------------------------------

def sinusoidal_pe(seq_len, embed_dim):
    pos = jnp.arange(seq_len, dtype=jnp.float32)[:, None]
    div = jnp.exp(jnp.arange(0, embed_dim, 2, dtype=jnp.float32)
                  * (-math.log(10000.0) / embed_dim))
    pe = jnp.zeros((seq_len, embed_dim), jnp.float32)
    pe = pe.at[:, 0::2].set(jnp.sin(pos * div))
    pe = pe.at[:, 1::2].set(jnp.cos(pos * div)[:, : embed_dim // 2])
    return pe


def transformer_forward(params, src_ids, tgt_ids, cfg):
    E = cfg["embed_dim"]
    H = cfg["num_heads"]
    emb_scale = math.sqrt(E)
    emb = params["embedding"]                                    # [V, E] f32
    # Embedding gather + PE add left to XLA (tiny, data-dependent gather).
    src = jnp.take(emb, src_ids, axis=0) * emb_scale             # [B, Ss, E]
    tgt = jnp.take(emb, tgt_ids, axis=0) * emb_scale             # [B, St, E]
    src = (src + sinusoidal_pe(src.shape[1], E)[None]).astype(jnp.bfloat16)
    tgt = (tgt + sinusoidal_pe(tgt.shape[1], E)[None]).astype(jnp.bfloat16)

    # ---------------- encoder ----------------
    mem = src
    n_enc = len(params["enc_layers"])
    for li, p in enumerate(params["enc_layers"]):
        final = (params["enc_norm_w"], params["enc_norm_b"]) if li == n_enc - 1 else None
        mem = pl_attn_block(mem, mem, p["self_attn"], p["norm1_w"], p["norm1_b"], H)
        mem = pl_ffn_block(mem, p, p["norm2_w"], p["norm2_b"], extra_norm=final)

    # ---------------- decoder ----------------
    x = tgt
    n_dec = len(params["dec_layers"])
    for li, p in enumerate(params["dec_layers"]):
        final = (params["dec_norm_w"], params["dec_norm_b"]) if li == n_dec - 1 else None
        x = pl_attn_block(x, x, p["self_attn"], p["norm1_w"], p["norm1_b"], H)
        x = pl_attn_block(x, mem, p["cross_attn"], p["norm2_w"], p["norm2_b"], H)
        x = pl_ffn_block(x, p, p["norm3_w"], p["norm3_b"], extra_norm=final)

    return pl_proj_softmax(x, params["out_w"], params["out_b"])


# ----------------------------- parameter init ------------------------------

def _init_params(key, cfg):
    V, E, Fd = cfg["num_embed"], cfg["embed_dim"], cfg["feed_forward_dim"]
    keys = iter(jax.random.split(key, 256))

    def w(shape):
        return (0.02 * jax.random.normal(next(keys), shape)).astype(jnp.bfloat16)

    def attn_params():
        return {"w_in": w((E, 3 * E)), "b_in": jnp.zeros((3 * E,), jnp.float32),
                "w_out": w((E, E)), "b_out": jnp.zeros((E,), jnp.float32)}

    def enc_layer_params():
        return {"self_attn": attn_params(),
                "ff_w1": w((E, Fd)), "ff_b1": jnp.zeros((Fd,), jnp.float32),
                "ff_w2": w((Fd, E)), "ff_b2": jnp.zeros((E,), jnp.float32),
                "norm1_w": jnp.ones((E,), jnp.float32), "norm1_b": jnp.zeros((E,), jnp.float32),
                "norm2_w": jnp.ones((E,), jnp.float32), "norm2_b": jnp.zeros((E,), jnp.float32)}

    def dec_layer_params():
        p = enc_layer_params()
        p["cross_attn"] = attn_params()
        p["norm3_w"] = jnp.ones((E,), jnp.float32)
        p["norm3_b"] = jnp.zeros((E,), jnp.float32)
        return p

    return {
        "embedding": jax.random.normal(next(keys), (V, E)).astype(jnp.float32),
        "enc_layers": [enc_layer_params() for _ in range(cfg["num_enc_layers"])],
        "dec_layers": [dec_layer_params() for _ in range(cfg["num_dec_layers"])],
        "enc_norm_w": jnp.ones((E,), jnp.float32), "enc_norm_b": jnp.zeros((E,), jnp.float32),
        "dec_norm_w": jnp.ones((E,), jnp.float32), "dec_norm_b": jnp.zeros((E,), jnp.float32),
        "out_w": w((E, V)), "out_b": jnp.zeros((V,), jnp.float32),
    }


# ----------------------------- main ------------------------------

if __name__ == "__main__":
    cfg = dict(num_embed=64, embed_dim=32, max_seq_len=16, num_heads=4,
               num_enc_layers=2, num_dec_layers=2, feed_forward_dim=64, dropout=0.1)

    key = jax.random.PRNGKey(0)
    k_param, k_src, k_tgt = jax.random.split(key, 3)
    params = _init_params(k_param, cfg)

    B, S = 2, 8
    src_ids = jax.random.randint(k_src, (B, S), 0, cfg["num_embed"], dtype=jnp.int32)
    tgt_ids = jax.random.randint(k_tgt, (B, S), 0, cfg["num_embed"], dtype=jnp.int32)

    _single_buffer_ok()   # prime the pipeline_mode probe outside of jit tracing

    fwd = jax.jit(lambda s, t: transformer_forward(params, s, t, cfg))
    out = jax.block_until_ready(fwd(src_ids, tgt_ids))

    assert out.shape == (B, S, cfg["num_embed"])
    assert bool(jnp.all(jnp.isfinite(out)))
    row_sums = jnp.sum(out, axis=-1)
    assert bool(jnp.allclose(row_sums, 1.0, atol=1e-4))  # eval-mode softmax output
    print("KERNEL_OK")
</pallas_src>

<mosaic_0001>
module attributes {stable_mosaic.version = 11 : i64} {
  func.func @_ffn_block_kernel(%arg0: i32, %arg1: i32, %arg2: memref<16x32xbf16, #tpu.memory_space<vmem>>, %arg3: memref<32x64xbf16, #tpu.memory_space<vmem>>, %arg4: memref<1x64xf32, #tpu.memory_space<vmem>>, %arg5: memref<64x32xbf16, #tpu.memory_space<vmem>>, %arg6: memref<1x32xf32, #tpu.memory_space<vmem>>, %arg7: memref<1x32xf32, #tpu.memory_space<vmem>>, %arg8: memref<1x32xf32, #tpu.memory_space<vmem>>, %arg9: memref<1x32xf32, #tpu.memory_space<vmem>>, %arg10: memref<1x32xf32, #tpu.memory_space<vmem>>, %arg11: memref<16x32xbf16, #tpu.memory_space<vmem>>, %arg12: memref<16x32xf32, #tpu.memory_space<vmem>>) attributes {dimension_semantics = [#tpu.dimension_semantics<parallel>, #tpu.dimension_semantics<arbitrary>], iteration_bounds = array<i64: 1, 1>, scalar_prefetch = 0 : i64, scratch_operands = 1 : i64, tpu.core_type = #tpu.core_type<tc>, window_params = [{transform_indices = @transform_0, window_bounds = array<i64: 16, 32>}, {transform_indices = @transform_1, window_bounds = array<i64: 32, 64>}, {transform_indices = @transform_2, window_bounds = array<i64: 1, 64>}, {transform_indices = @transform_3, window_bounds = array<i64: 64, 32>}, {pipeline_mode = #tpu.pipeline_mode<synchronous>, transform_indices = @transform_4, window_bounds = array<i64: 1, 32>}, {pipeline_mode = #tpu.pipeline_mode<synchronous>, transform_indices = @transform_5, window_bounds = array<i64: 1, 32>}, {pipeline_mode = #tpu.pipeline_mode<synchronous>, transform_indices = @transform_6, window_bounds = array<i64: 1, 32>}, {pipeline_mode = #tpu.pipeline_mode<synchronous>, transform_indices = @transform_7, window_bounds = array<i64: 1, 32>}, {pipeline_mode = #tpu.pipeline_mode<synchronous>, transform_indices = @transform_8, window_bounds = array<i64: 1, 32>}, {transform_indices = @transform_9, window_bounds = array<i64: 16, 32>}]} {
    %c0_i32 = arith.constant 0 : i32
    %0 = arith.cmpi eq, %arg1, %c0_i32 : i32
    %1 = arith.extui %0 : i1 to i32
    %c0_i32_0 = arith.constant 0 : i32
    %2 = arith.cmpi ne, %1, %c0_i32_0 : i32
    scf.if %2 {
      %cst_31 = arith.constant 0.000000e+00 : f32
      %59 = vector.broadcast %cst_31 : f32 to vector<16x32xf32>
      %c0_32 = arith.constant 0 : index
      %c0_33 = arith.constant 0 : index
      %60 = vector.load %arg12[%c0_32, %c0_33] : memref<16x32xf32, #tpu.memory_space<vmem>>, vector<16x32xf32>
      tpu.vector_store %arg12[%c0_32, %c0_33], %59 {strides = array<i32>} : memref<16x32xf32, #tpu.memory_space<vmem>>, vector<16x32xf32>,
    } else {
    }
    %c0 = arith.constant 0 : index
    %c0_1 = arith.constant 0 : index
    %3 = vector.load %arg2[%c0, %c0_1] : memref<16x32xbf16, #tpu.memory_space<vmem>>, vector<16x32xbf16>
    %c0_2 = arith.constant 0 : index
    %c0_3 = arith.constant 0 : index
    %4 = vector.load %arg3[%c0_2, %c0_3] : memref<32x64xbf16, #tpu.memory_space<vmem>>, vector<32x64xbf16>
    %cst = arith.constant dense<0.000000e+00> : vector<16x64xf32>
    %5 = tpu.matmul %3, %4, %cst {dimension_numbers = #tpu.dot_dimension_numbers<[1], [0], [0], [1], [0, 0, 1, 1], [], []>} : vector<16x32xbf16>, vector<32x64xbf16>, vector<16x64xf32> -> vector<16x64xf32>
    %c0_4 = arith.constant 0 : index
    %c0_5 = arith.constant 0 : index
    %6 = vector.load %arg4[%c0_4, %c0_5] : memref<1x64xf32, #tpu.memory_space<vmem>>, vector<1x64xf32>
    %7 = vector.broadcast %6 : vector<1x64xf32> to vector<16x64xf32>
    %8 = arith.addf %5, %7 : vector<16x64xf32>
    %cst_6 = arith.constant 5.000000e-01 : f32
    %9 = vector.broadcast %cst_6 : f32 to vector<16x64xf32>
    %10 = arith.mulf %9, %8 : vector<16x64xf32>
    %cst_7 = arith.constant 0.707106769 : f32
    %11 = vector.broadcast %cst_7 : f32 to vector<16x64xf32>
    %12 = arith.mulf %8, %11 : vector<16x64xf32>
    %cst_8 = arith.constant 0.000000e+00 : f32
    %13 = vector.broadcast %cst_8 : f32 to vector<16x64xf32>
    %14 = arith.cmpf oge, %12, %13 : vector<16x64xf32>
    %cst_9 = arith.constant 1.000000e+00 : f32
    %cst_10 = arith.constant -1.000000e+00 : f32
    %15 = vector.broadcast %cst_9 : f32 to vector<16x64xf32>
    %16 = vector.broadcast %cst_10 : f32 to vector<16x64xf32>
    %17 = arith.select %14, %15, %16 : vector<16x64xi1>, vector<16x64xf32>
    %18 = math.absf %12 : vector<16x64xf32>
    %cst_11 = arith.constant 0.327591091 : f32
    %19 = vector.broadcast %cst_11 : f32 to vector<16x64xf32>
    %20 = arith.mulf %19, %18 : vector<16x64xf32>
    %cst_12 = arith.constant 1.000000e+00 : f32
    %21 = vector.broadcast %cst_12 : f32 to vector<16x64xf32>
    %22 = arith.addf %21, %20 : vector<16x64xf32>
    %cst_13 = arith.constant 1.000000e+00 : f32
    %23 = vector.broadcast %cst_13 : f32 to vector<16x64xf32>
    %24 = arith.divf %23, %22 : vector<16x64xf32>
    %cst_14 = arith.constant 1.06140542 : f32
    %25 = vector.broadcast %cst_14 : f32 to vector<16x64xf32>
    %26 = arith.mulf %25, %24 : vector<16x64xf32>
    %cst_15 = arith.constant -1.45315206 : f32
    %27 = vector.broadcast %cst_15 : f32 to vector<16x64xf32>
    %28 = arith.addf %26, %27 : vector<16x64xf32>
    %29 = arith.mulf %28, %24 : vector<16x64xf32>
    %cst_16 = arith.constant 1.42141378 : f32
    %30 = vector.broadcast %cst_16 : f32 to vector<16x64xf32>
    %31 = arith.addf %29, %30 : vector<16x64xf32>
    %32 = arith.mulf %31, %24 : vector<16x64xf32>
    %cst_17 = arith.constant -0.284496725 : f32
    %33 = vector.broadcast %cst_17 : f32 to vector<16x64xf32>
    %34 = arith.addf %32, %33 : vector<16x64xf32>
    %35 = arith.mulf %34, %24 : vector<16x64xf32>
    %cst_18 = arith.constant 0.254829586 : f32
    %36 = vector.broadcast %cst_18 : f32 to vector<16x64xf32>
    %37 = arith.addf %35, %36 : vector<16x64xf32>
    %38 = arith.mulf %37, %24 : vector<16x64xf32>
    %cst_19 = arith.constant 0.000000e+00 : f32
    %39 = vector.broadcast %cst_19 : f32 to vector<16x64xf32>
    %40 = arith.subf %39, %18 : vector<16x64xf32>
    %41 = arith.mulf %40, %18 : vector<16x64xf32>
    %42 = math.exp %41 : vector<16x64xf32>
    %43 = arith.mulf %38, %42 : vector<16x64xf32>
    %cst_20 = arith.constant 1.000000e+00 : f32
    %44 = vector.broadcast %cst_20 : f32 to vector<16x64xf32>
    %45 = arith.subf %44, %43 : vector<16x64xf32>
    %46 = arith.mulf %17, %45 : vector<16x64xf32>
    %cst_21 = arith.constant 1.000000e+00 : f32
    %47 = vector.broadcast %cst_21 : f32 to vector<16x64xf32>
    %48 = arith.addf %47, %46 : vector<16x64xf32>
    %49 = arith.mulf %10, %48 : vector<16x64xf32>
    %50 = arith.truncf %49 : vector<16x64xf32> to vector<16x64xbf16>
    %c0_22 = arith.constant 0 : index
    %c0_23 = arith.constant 0 : index
    %51 = vector.load %arg12[%c0_22, %c0_23] : memref<16x32xf32, #tpu.memory_space<vmem>>, vector<16x32xf32>
    %c0_24 = arith.constant 0 : index
    %c0_25 = arith.constant 0 : index
    %52 = vector.load %arg5[%c0_24, %c0_25] : memref<64x32xbf16, #tpu.memory_space<vmem>>, vector<64x32xbf16>
    %cst_26 = arith.constant dense<0.000000e+00> : vector<16x32xf32>
    %53 = tpu.matmul %50, %52, %cst_26 {dimension_numbers = #tpu.dot_dimension_numbers<[1], [0], [0], [1], [0, 0, 1, 1], [], []>} : vector<16x64xbf16>, vector<64x32xbf16>, vector<16x32xf32> -> vector<16x32xf32>
    %54 = arith.addf %51, %53 : vector<16x32xf32>
    %c0_27 = arith.constant 0 : index
    %c0_28 = arith.constant 0 : index
    %55 = vector.load %arg12[%c0_27, %c0_28] : memref<16x32xf32, #tpu.memory_space<vmem>>, vector<16x32xf32>
    tpu.vector_store %arg12[%c0_27, %c0_28], %54 {strides = array<i32>} : memref<16x32xf32, #tpu.memory_space<vmem>>, vector<16x32xf32>,
    %c0_i32_29 = arith.constant 0 : i32
    %56 = arith.cmpi eq, %arg1, %c0_i32_29 : i32
    %57 = arith.extui %56 : i1 to i32
    %c0_i32_30 = arith.constant 0 : i32
    %58 = arith.cmpi ne, %57, %c0_i32_30 : i32
    scf.if %58 {
      %59 = arith.extf %3 : vector<16x32xbf16> to vector<16x32xf32>
      %c0_31 = arith.constant 0 : index
      %c0_32 = arith.constant 0 : index
      %60 = vector.load %arg12[%c0_31, %c0_32] : memref<16x32xf32, #tpu.memory_space<vmem>>, vector<16x32xf32>
      %61 = arith.addf %59, %60 : vector<16x32xf32>
      %c0_33 = arith.constant 0 : index
      %c0_34 = arith.constant 0 : index
      %62 = vector.load %arg6[%c0_33, %c0_34] : memref<1x32xf32, #tpu.memory_space<vmem>>, vector<1x32xf32>
      %63 = vector.broadcast %62 : vector<1x32xf32> to vector<16x32xf32>
      %64 = arith.addf %61, %63 : vector<16x32xf32>
      %c0_35 = arith.constant 0 : index
      %c0_36 = arith.constant 0 : index
      %65 = vector.load %arg7[%c0_35, %c0_36] : memref<1x32xf32, #tpu.memory_space<vmem>>, vector<1x32xf32>
      %c0_37 = arith.constant 0 : index
      %c0_38 = arith.constant 0 : index
      %66 = vector.load %arg8[%c0_37, %c0_38] : memref<1x32xf32, #tpu.memory_space<vmem>>, vector<1x32xf32>
      %cst_39 = arith.constant dense<0.000000e+00> : vector<16xf32>
      %67 = vector.multi_reduction <add>, %64, %cst_39 [1] : vector<16x32xf32> to vector<16xf32>
      %68 = vector.shape_cast %67 : vector<16xf32> to vector<16x1xf32>
      %cst_40 = arith.constant 3.200000e+01 : f32
      %69 = vector.broadcast %cst_40 : f32 to vector<16x1xf32>
      %70 = arith.divf %68, %69 : vector<16x1xf32>
      %71 = vector.broadcast %70 : vector<16x1xf32> to vector<16x32xf32>
      %72 = arith.subf %64, %71 : vector<16x32xf32>
      %73 = arith.mulf %72, %72 : vector<16x32xf32>
      %cst_41 = arith.constant dense<0.000000e+00> : vector<16xf32>
      %74 = vector.multi_reduction <add>, %73, %cst_41 [1] : vector<16x32xf32> to vector<16xf32>
      %75 = vector.shape_cast %74 : vector<16xf32> to vector<16x1xf32>
      %cst_42 = arith.constant 3.200000e+01 : f32
      %76 = vector.broadcast %cst_42 : f32 to vector<16x1xf32>
      %77 = arith.divf %75, %76 : vector<16x1xf32>
      %cst_43 = arith.constant 9.99999974E-6 : f32
      %78 = vector.broadcast %cst_43 : f32 to vector<16x1xf32>
      %79 = arith.addf %77, %78 : vector<16x1xf32>
      %80 = math.rsqrt %79 : vector<16x1xf32>
      %81 = vector.broadcast %80 : vector<16x1xf32> to vector<16x32xf32>
      %82 = arith.mulf %72, %81 : vector<16x32xf32>
      %83 = vector.broadcast %65 : vector<1x32xf32> to vector<16x32xf32>
      %84 = arith.mulf %82, %83 : vector<16x32xf32>
      %85 = vector.broadcast %66 : vector<1x32xf32> to vector<16x32xf32>
      %86 = arith.addf %84, %85 : vector<16x32xf32>
      %87 = arith.truncf %86 : vector<16x32xf32> to vector<16x32xbf16>
      %c0_44 = arith.constant 0 : index
      %c0_45 = arith.constant 0 : index
      %88 = vector.load %arg11[%c0_44, %c0_45] : memref<16x32xbf16, #tpu.memory_space<vmem>>, vector<16x32xbf16>
      tpu.vector_store %arg11[%c0_44, %c0_45], %87 {strides = array<i32>} : memref<16x32xbf16, #tpu.memory_space<vmem>>, vector<16x32xbf16>,
    } else {
    }
    return
  }
  func.func @transform_0(%arg0: i32, %arg1: i32) -> (i32, i32) {
    %c0_i32 = arith.constant 0 : i32
    %c0_i32_0 = arith.constant 0 : i32
    return %arg0, %c0_i32 : i32, i32
  }
  func.func @transform_1(%arg0: i32, %arg1: i32) -> (i32, i32) {
    %c0_i32 = arith.constant 0 : i32
    %c0_i32_0 = arith.constant 0 : i32
    return %c0_i32, %arg1 : i32, i32
  }
  func.func @transform_2(%arg0: i32, %arg1: i32) -> (i32, i32) {
    %c0_i32 = arith.constant 0 : i32
    %c0_i32_0 = arith.constant 0 : i32
    return %c0_i32, %arg1 : i32, i32
  }
  func.func @transform_3(%arg0: i32, %arg1: i32) -> (i32, i32) {
    %c0_i32 = arith.constant 0 : i32
    %c0_i32_0 = arith.constant 0 : i32
    return %arg1, %c0_i32 : i32, i32
  }
  func.func @transform_4(%arg0: i32, %arg1: i32) -> (i32, i32) {
    %c0_i32 = arith.constant 0 : i32
    %c0_i32_0 = arith.constant 0 : i32
    %c0_i32_1 = arith.constant 0 : i32
    return %c0_i32, %c0_i32_0 : i32, i32
  }
  func.func @transform_5(%arg0: i32, %arg1: i32) -> (i32, i32) {
    %c0_i32 = arith.constant 0 : i32
    %c0_i32_0 = arith.constant 0 : i32
    %c0_i32_1 = arith.constant 0 : i32
    return %c0_i32, %c0_i32_0 : i32, i32
  }
  func.func @transform_6(%arg0: i32, %arg1: i32) -> (i32, i32) {
    %c0_i32 = arith.constant 0 : i32
    %c0_i32_0 = arith.constant 0 : i32
    %c0_i32_1 = arith.constant 0 : i32
    return %c0_i32, %c0_i32_0 : i32, i32
  }
  func.func @transform_7(%arg0: i32, %arg1: i32) -> (i32, i32) {
    %c0_i32 = arith.constant 0 : i32
    %c0_i32_0 = arith.constant 0 : i32
    %c0_i32_1 = arith.constant 0 : i32
    return %c0_i32, %c0_i32_0 : i32, i32
  }
  func.func @transform_8(%arg0: i32, %arg1: i32) -> (i32, i32) {
    %c0_i32 = arith.constant 0 : i32
    %c0_i32_0 = arith.constant 0 : i32
    %c0_i32_1 = arith.constant 0 : i32
    return %c0_i32, %c0_i32_0 : i32, i32
  }
  func.func @transform_9(%arg0: i32, %arg1: i32) -> (i32, i32) {
    %c0_i32 = arith.constant 0 : i32
    %c0_i32_0 = arith.constant 0 : i32
    return %arg0, %c0_i32 : i32, i32
  }
}

module attributes {stable_mosaic.version = 11 : i64} {
  func.func @_attn_block_kernel(%arg0: i32, %arg1: i32, %arg2: memref<1x8x32xbf16, #tpu.memory_space<vmem>>, %arg3: memref<1x8x32xbf16, #tpu.memory_space<vmem>>, %arg4: memref<4x32x8xbf16, #tpu.memory_space<vmem>>, %arg5: memref<4x1x8xf32, #tpu.memory_space<vmem>>, %arg6: memref<8x32x8xbf16, #tpu.memory_space<vmem>>, %arg7: memref<8x1x8xf32, #tpu.memory_space<vmem>>, %arg8: memref<32x32xbf16, #tpu.memory_space<vmem>>, %arg9: memref<1x32xf32, #tpu.memory_space<vmem>>, %arg10: memref<1x32xf32, #tpu.memory_space<vmem>>, %arg11: memref<1x32xf32, #tpu.memory_space<vmem>>, %arg12: memref<1x8x32xbf16, #tpu.memory_space<vmem>>, %arg13: memref<4x8x8xbf16, #tpu.memory_space<vmem>>, %arg14: memref<4x8x8xbf16, #tpu.memory_space<vmem>>) attributes {dimension_semantics = [#tpu.dimension_semantics<parallel>, #tpu.dimension_semantics<arbitrary>], iteration_bounds = array<i64: 2, 1>, scalar_prefetch = 0 : i64, scratch_operands = 2 : i64, tpu.core_type = #tpu.core_type<tc>, window_params = [{transform_indices = @transform_0, window_bounds = array<i64: 1, 8, 32>}, {transform_indices = @transform_1, window_bounds = array<i64: 1, 8, 32>}, {pipeline_mode = #tpu.pipeline_mode<synchronous>, transform_indices = @transform_2, window_bounds = array<i64: 4, 32, 8>}, {pipeline_mode = #tpu.pipeline_mode<synchronous>, transform_indices = @transform_3, window_bounds = array<i64: 4, 1, 8>}, {pipeline_mode = #tpu.pipeline_mode<synchronous>, transform_indices = @transform_4, window_bounds = array<i64: 8, 32, 8>}, {pipeline_mode = #tpu.pipeline_mode<synchronous>, transform_indices = @transform_5, window_bounds = array<i64: 8, 1, 8>}, {pipeline_mode = #tpu.pipeline_mode<synchronous>, transform_indices = @transform_6, window_bounds = array<i64: 32, 32>}, {pipeline_mode = #tpu.pipeline_mode<synchronous>, transform_indices = @transform_7, window_bounds = array<i64: 1, 32>}, {pipeline_mode = #tpu.pipeline_mode<synchronous>, transform_indices = @transform_8, window_bounds = array<i64: 1, 32>}, {pipeline_mode = #tpu.pipeline_mode<synchronous>, transform_indices = @transform_9, window_bounds = array<i64: 1, 32>}, {transform_indices = @transform_10, window_bounds = array<i64: 1, 8, 32>}]} {
    %c0 = arith.constant 0 : index
    %c0_0 = arith.constant 0 : index
    %c0_1 = arith.constant 0 : index
    %0 = vector.load %arg2[%c0, %c0_0, %c0_1] : memref<1x8x32xbf16, #tpu.memory_space<vmem>>, vector<1x8x32xbf16>
    %1 = vector.shape_cast %0 : vector<1x8x32xbf16> to vector<8x32xbf16>
    %c0_i32 = arith.constant 0 : i32
    %2 = arith.cmpi eq, %arg1, %c0_i32 : i32
    %3 = arith.extui %2 : i1 to i32
    %c0_i32_2 = arith.constant 0 : i32
    %4 = arith.cmpi ne, %3, %c0_i32_2 : i32
    scf.if %4 {
      %c0_36 = arith.constant 0 : index
      %c0_37 = arith.constant 0 : index
      %c0_38 = arith.constant 0 : index
      %72 = vector.load %arg3[%c0_36, %c0_37, %c0_38] : memref<1x8x32xbf16, #tpu.memory_space<vmem>>, vector<1x8x32xbf16>
      %73 = vector.shape_cast %72 : vector<1x8x32xbf16> to vector<8x32xbf16>
      %74 = vector.shape_cast %73 : vector<8x32xbf16> to vector<1x8x32xbf16>
      %75 = vector.shape_cast %74 : vector<1x8x32xbf16> to vector<1x8x32xbf16>
      %76 = vector.broadcast %75 : vector<1x8x32xbf16> to vector<8x8x32xbf16>
      %c0_39 = arith.constant 0 : index
      %c0_40 = arith.constant 0 : index
      %c0_41 = arith.constant 0 : index
      %77 = vector.load %arg6[%c0_39, %c0_40, %c0_41] : memref<8x32x8xbf16, #tpu.memory_space<vmem>>, vector<8x32x8xbf16>
      %cst_42 = arith.constant dense<0.000000e+00> : vector<8x8x8xf32>
      %78 = tpu.matmul %76, %77, %cst_42 {dimension_numbers = #tpu.dot_dimension_numbers<[2], [1], [1], [2], [0, 0, 0, 1, 1, 2], [0], [0]>} : vector<8x8x32xbf16>, vector<8x32x8xbf16>, vector<8x8x8xf32> -> vector<8x8x8xf32>
      %c0_43 = arith.constant 0 : index
      %c0_44 = arith.constant 0 : index
      %c0_45 = arith.constant 0 : index
      %79 = vector.load %arg7[%c0_43, %c0_44, %c0_45] : memref<8x1x8xf32, #tpu.memory_space<vmem>>, vector<8x1x8xf32>
      %80 = vector.broadcast %79 : vector<8x1x8xf32> to vector<8x8x8xf32>
      %81 = arith.addf %78, %80 : vector<8x8x8xf32>
      %82 = vector.extract_strided_slice %81 {offsets = [0, 0, 0], sizes = [4, 8, 8], strides = [1, 1, 1]} : vector<8x8x8xf32> to vector<4x8x8xf32>
      %83 = arith.truncf %82 : vector<4x8x8xf32> to vector<4x8x8xbf16>
      %c0_46 = arith.constant 0 : index
      %c0_47 = arith.constant 0 : index
      %c0_48 = arith.constant 0 : index
      %84 = vector.load %arg13[%c0_46, %c0_47, %c0_48] : memref<4x8x8xbf16, #tpu.memory_space<vmem>>, vector<4x8x8xbf16>
      tpu.vector_store %arg13[%c0_46, %c0_47, %c0_48], %83 {strides = array<i32>} : memref<4x8x8xbf16, #tpu.memory_space<vmem>>, vector<4x8x8xbf16>,
      %85 = vector.extract_strided_slice %81 {offsets = [4, 0, 0], sizes = [4, 8, 8], strides = [1, 1, 1]} : vector<8x8x8xf32> to vector<4x8x8xf32>
      %86 = arith.truncf %85 : vector<4x8x8xf32> to vector<4x8x8xbf16>
      %c0_49 = arith.constant 0 : index
      %c0_50 = arith.constant 0 : index
      %c0_51 = arith.constant 0 : index
      %87 = vector.load %arg14[%c0_49, %c0_50, %c0_51] : memref<4x8x8xbf16, #tpu.memory_space<vmem>>, vector<4x8x8xbf16>
      tpu.vector_store %arg14[%c0_49, %c0_50, %c0_51], %86 {strides = array<i32>} : memref<4x8x8xbf16, #tpu.memory_space<vmem>>, vector<4x8x8xbf16>,
    } else {
    }
    %5 = vector.shape_cast %1 : vector<8x32xbf16> to vector<1x8x32xbf16>
    %6 = vector.shape_cast %5 : vector<1x8x32xbf16> to vector<1x8x32xbf16>
    %7 = vector.broadcast %6 : vector<1x8x32xbf16> to vector<4x8x32xbf16>
    %c0_3 = arith.constant 0 : index
    %c0_4 = arith.constant 0 : index
    %c0_5 = arith.constant 0 : index
    %8 = vector.load %arg4[%c0_3, %c0_4, %c0_5] : memref<4x32x8xbf16, #tpu.memory_space<vmem>>, vector<4x32x8xbf16>
    %cst = arith.constant dense<0.000000e+00> : vector<4x8x8xf32>
    %9 = tpu.matmul %7, %8, %cst {dimension_numbers = #tpu.dot_dimension_numbers<[2], [1], [1], [2], [0, 0, 0, 1, 1, 2], [0], [0]>} : vector<4x8x32xbf16>, vector<4x32x8xbf16>, vector<4x8x8xf32> -> vector<4x8x8xf32>
    %c0_6 = arith.constant 0 : index
    %c0_7 = arith.constant 0 : index
    %c0_8 = arith.constant 0 : index
    %10 = vector.load %arg5[%c0_6, %c0_7, %c0_8] : memref<4x1x8xf32, #tpu.memory_space<vmem>>, vector<4x1x8xf32>
    %11 = vector.broadcast %10 : vector<4x1x8xf32> to vector<4x8x8xf32>
    %12 = arith.addf %9, %11 : vector<4x8x8xf32>
    %13 = arith.truncf %12 : vector<4x8x8xf32> to vector<4x8x8xbf16>
    %c0_9 = arith.constant 0 : index
    %c0_10 = arith.constant 0 : index
    %c0_11 = arith.constant 0 : index
    %14 = vector.load %arg13[%c0_9, %c0_10, %c0_11] : memref<4x8x8xbf16, #tpu.memory_space<vmem>>, vector<4x8x8xbf16>
    %c0_12 = arith.constant 0 : index
    %c0_13 = arith.constant 0 : index
    %c0_14 = arith.constant 0 : index
    %15 = vector.load %arg14[%c0_12, %c0_13, %c0_14] : memref<4x8x8xbf16, #tpu.memory_space<vmem>>, vector<4x8x8xbf16>
    %cst_15 = arith.constant dense<0.000000e+00> : vector<4x8x8xf32>
    %16 = tpu.matmul %13, %14, %cst_15 {dimension_numbers = #tpu.dot_dimension_numbers<[2], [2], [1], [1], [0, 0, 0, 1, 1, 1], [0], [0]>} : vector<4x8x8xbf16>, vector<4x8x8xbf16>, vector<4x8x8xf32> -> vector<4x8x8xf32>
    %cst_16 = arith.constant dense<0xFF800000> : vector<4x8xf32>
    %17 = vector.multi_reduction <maximumf>, %16, %cst_16 [2] : vector<4x8x8xf32> to vector<4x8xf32>
    %18 = vector.shape_cast %17 : vector<4x8xf32> to vector<4x8x1xf32>
    %19 = vector.broadcast %18 : vector<4x8x1xf32> to vector<4x8x8xf32>
    %20 = arith.subf %16, %19 : vector<4x8x8xf32>
    %21 = math.exp %20 : vector<4x8x8xf32>
    %cst_17 = arith.constant dense<0.000000e+00> : vector<4x8xf32>
    %22 = vector.multi_reduction <add>, %21, %cst_17 [2] : vector<4x8x8xf32> to vector<4x8xf32>
    %23 = vector.shape_cast %22 : vector<4x8xf32> to vector<4x8x1xf32>
    %24 = tpu.reciprocal %23 {approx = true} : vector<4x8x1xf32> -> vector<4x8x1xf32>
    %25 = vector.broadcast %24 : vector<4x8x1xf32> to vector<4x8x8xf32>
    %26 = arith.mulf %21, %25 : vector<4x8x8xf32>
    %27 = arith.truncf %26 : vector<4x8x8xf32> to vector<4x8x8xbf16>
    %cst_18 = arith.constant dense<0.000000e+00> : vector<4x8x8xf32>
    %28 = tpu.matmul %27, %15, %cst_18 {dimension_numbers = #tpu.dot_dimension_numbers<[2], [1], [1], [2], [0, 0, 0, 1, 1, 2], [0], [0]>} : vector<4x8x8xbf16>, vector<4x8x8xbf16>, vector<4x8x8xf32> -> vector<4x8x8xf32>
    %29 = vector.extract_strided_slice %28 {offsets = [0, 0, 0], sizes = [1, 8, 8], strides = [1, 1, 1]} : vector<4x8x8xf32> to vector<1x8x8xf32>
    %30 = vector.shape_cast %29 : vector<1x8x8xf32> to vector<8x8xf32>
    %31 = vector.extract_strided_slice %28 {offsets = [1, 0, 0], sizes = [1, 8, 8], strides = [1, 1, 1]} : vector<4x8x8xf32> to vector<1x8x8xf32>
    %32 = vector.shape_cast %31 : vector<1x8x8xf32> to vector<8x8xf32>
    %33 = vector.extract_strided_slice %28 {offsets = [2, 0, 0], sizes = [1, 8, 8], strides = [1, 1, 1]} : vector<4x8x8xf32> to vector<1x8x8xf32>
    %34 = vector.shape_cast %33 : vector<1x8x8xf32> to vector<8x8xf32>
    %35 = vector.extract_strided_slice %28 {offsets = [3, 0, 0], sizes = [1, 8, 8], strides = [1, 1, 1]} : vector<4x8x8xf32> to vector<1x8x8xf32>
    %36 = vector.shape_cast %35 : vector<1x8x8xf32> to vector<8x8xf32>
    %37 = tpu.concatenate %30, %32, %34, %36 in 1 : vector<8x8xf32>, vector<8x8xf32>, vector<8x8xf32>, vector<8x8xf32> -> vector<8x32xf32>
    %38 = arith.truncf %37 : vector<8x32xf32> to vector<8x32xbf16>
    %c0_19 = arith.constant 0 : index
    %c0_20 = arith.constant 0 : index
    %39 = vector.load %arg8[%c0_19, %c0_20] : memref<32x32xbf16, #tpu.memory_space<vmem>>, vector<32x32xbf16>
    %cst_21 = arith.constant dense<0.000000e+00> : vector<8x32xf32>
    %40 = tpu.matmul %38, %39, %cst_21 {dimension_numbers = #tpu.dot_dimension_numbers<[1], [0], [0], [1], [0, 0, 1, 1], [], []>} : vector<8x32xbf16>, vector<32x32xbf16>, vector<8x32xf32> -> vector<8x32xf32>
    %c0_22 = arith.constant 0 : index
    %c0_23 = arith.constant 0 : index
    %41 = vector.load %arg9[%c0_22, %c0_23] : memref<1x32xf32, #tpu.memory_space<vmem>>, vector<1x32xf32>
    %42 = vector.broadcast %41 : vector<1x32xf32> to vector<8x32xf32>
    %43 = arith.addf %40, %42 : vector<8x32xf32>
    %44 = arith.extf %1 : vector<8x32xbf16> to vector<8x32xf32>
    %45 = arith.addf %44, %43 : vector<8x32xf32>
    %c0_24 = arith.constant 0 : index
    %c0_25 = arith.constant 0 : index
    %46 = vector.load %arg10[%c0_24, %c0_25] : memref<1x32xf32, #tpu.memory_space<vmem>>, vector<1x32xf32>
    %c0_26 = arith.constant 0 : index
    %c0_27 = arith.constant 0 : index
    %47 = vector.load %arg11[%c0_26, %c0_27] : memref<1x32xf32, #tpu.memory_space<vmem>>, vector<1x32xf32>
    %cst_28 = arith.constant dense<0.000000e+00> : vector<8xf32>
    %48 = vector.multi_reduction <add>, %45, %cst_28 [1] : vector<8x32xf32> to vector<8xf32>
    %49 = vector.shape_cast %48 : vector<8xf32> to vector<8x1xf32>
    %cst_29 = arith.constant 3.200000e+01 : f32
    %50 = vector.broadcast %cst_29 : f32 to vector<8x1xf32>
    %51 = arith.divf %49, %50 : vector<8x1xf32>
    %52 = vector.broadcast %51 : vector<8x1xf32> to vector<8x32xf32>
    %53 = arith.subf %45, %52 : vector<8x32xf32>
    %54 = arith.mulf %53, %53 : vector<8x32xf32>
    %cst_30 = arith.constant dense<0.000000e+00> : vector<8xf32>
    %55 = vector.multi_reduction <add>, %54, %cst_30 [1] : vector<8x32xf32> to vector<8xf32>
    %56 = vector.shape_cast %55 : vector<8xf32> to vector<8x1xf32>
    %cst_31 = arith.constant 3.200000e+01 : f32
    %57 = vector.broadcast %cst_31 : f32 to vector<8x1xf32>
    %58 = arith.divf %56, %57 : vector<8x1xf32>
    %cst_32 = arith.constant 9.99999974E-6 : f32
    %59 = vector.broadcast %cst_32 : f32 to vector<8x1xf32>
    %60 = arith.addf %58, %59 : vector<8x1xf32>
    %61 = math.rsqrt %60 : vector<8x1xf32>
    %62 = vector.broadcast %61 : vector<8x1xf32> to vector<8x32xf32>
    %63 = arith.mulf %53, %62 : vector<8x32xf32>
    %64 = vector.broadcast %46 : vector<1x32xf32> to vector<8x32xf32>
    %65 = arith.mulf %63, %64 : vector<8x32xf32>
    %66 = vector.broadcast %47 : vector<1x32xf32> to vector<8x32xf32>
    %67 = arith.addf %65, %66 : vector<8x32xf32>
    %68 = arith.truncf %67 : vector<8x32xf32> to vector<8x32xbf16>
    %c0_33 = arith.constant 0 : index
    %c0_34 = arith.constant 0 : index
    %c0_35 = arith.constant 0 : index
    %69 = vector.load %arg12[%c0_33, %c0_34, %c0_35] : memref<1x8x32xbf16, #tpu.memory_space<vmem>>, vector<1x8x32xbf16>
    %70 = vector.shape_cast %69 : vector<1x8x32xbf16> to vector<8x32xbf16>
    %71 = vector.shape_cast %68 : vector<8x32xbf16> to vector<1x8x32xbf16>
    tpu.vector_store %arg12[%c0_33, %c0_34, %c0_35], %71 {strides = array<i32>} : memref<1x8x32xbf16, #tpu.memory_space<vmem>>, vector<1x8x32xbf16>,
    return
  }
  func.func @transform_0(%arg0: i32, %arg1: i32) -> (i32, i32, i32) {
    %c0_i32 = arith.constant 0 : i32
    %c0_i32_0 = arith.constant 0 : i32
    return %arg0, %arg1, %c0_i32 : i32, i32, i32
  }
  func.func @transform_1(%arg0: i32, %arg1: i32) -> (i32, i32, i32) {
    %c0_i32 = arith.constant 0 : i32
    %c0_i32_0 = arith.constant 0 : i32
    %c0_i32_1 = arith.constant 0 : i32
    return %arg0, %c0_i32, %c0_i32_0 : i32, i32, i32
  }
  func.func @transform_2(%arg0: i32, %arg1: i32) -> (i32, i32, i32) {
    %c0_i32 = arith.constant 0 : i32
    %c0_i32_0 = arith.constant 0 : i32
    %c0_i32_1 = arith.constant 0 : i32
    %c0_i32_2 = arith.constant 0 : i32
    return %c0_i32, %c0_i32_0, %c0_i32_1 : i32, i32, i32
  }
  func.func @transform_3(%arg0: i32, %arg1: i32) -> (i32, i32, i32) {
    %c0_i32 = arith.constant 0 : i32
    %c0_i32_0 = arith.constant 0 : i32
    %c0_i32_1 = arith.constant 0 : i32
    %c0_i32_2 = arith.constant 0 : i32
    return %c0_i32, %c0_i32_0, %c0_i32_1 : i32, i32, i32
  }
  func.func @transform_4(%arg0: i32, %arg1: i32) -> (i32, i32, i32) {
    %c0_i32 = arith.constant 0 : i32
    %c0_i32_0 = arith.constant 0 : i32
    %c0_i32_1 = arith.constant 0 : i32
    %c0_i32_2 = arith.constant 0 : i32
    return %c0_i32, %c0_i32_0, %c0_i32_1 : i32, i32, i32
  }
  func.func @transform_5(%arg0: i32, %arg1: i32) -> (i32, i32, i32) {
    %c0_i32 = arith.constant 0 : i32
    %c0_i32_0 = arith.constant 0 : i32
    %c0_i32_1 = arith.constant 0 : i32
    %c0_i32_2 = arith.constant 0 : i32
    return %c0_i32, %c0_i32_0, %c0_i32_1 : i32, i32, i32
  }
  func.func @transform_6(%arg0: i32, %arg1: i32) -> (i32, i32) {
    %c0_i32 = arith.constant 0 : i32
    %c0_i32_0 = arith.constant 0 : i32
    %c0_i32_1 = arith.constant 0 : i32
    return %c0_i32, %c0_i32_0 : i32, i32
  }
  func.func @transform_7(%arg0: i32, %arg1: i32) -> (i32, i32) {
    %c0_i32 = arith.constant 0 : i32
    %c0_i32_0 = arith.constant 0 : i32
    %c0_i32_1 = arith.constant 0 : i32
    return %c0_i32, %c0_i32_0 : i32, i32
  }
  func.func @transform_8(%arg0: i32, %arg1: i32) -> (i32, i32) {
    %c0_i32 = arith.constant 0 : i32
    %c0_i32_0 = arith.constant 0 : i32
    %c0_i32_1 = arith.constant 0 : i32
    return %c0_i32, %c0_i32_0 : i32, i32
  }
  func.func @transform_9(%arg0: i32, %arg1: i32) -> (i32, i32) {
    %c0_i32 = arith.constant 0 : i32
    %c0_i32_0 = arith.constant 0 : i32
    %c0_i32_1 = arith.constant 0 : i32
    return %c0_i32, %c0_i32_0 : i32, i32
  }
  func.func @transform_10(%arg0: i32, %arg1: i32) -> (i32, i32, i32) {
    %c0_i32 = arith.constant 0 : i32
    %c0_i32_0 = arith.constant 0 : i32
    return %arg0, %arg1, %c0_i32 : i32, i32, i32
  }
}

module attributes {stable_mosaic.version = 11 : i64} {
  func.func @_ffn_block_kernel(%arg0: i32, %arg1: i32, %arg2: memref<16x32xbf16, #tpu.memory_space<vmem>>, %arg3: memref<32x64xbf16, #tpu.memory_space<vmem>>, %arg4: memref<1x64xf32, #tpu.memory_space<vmem>>, %arg5: memref<64x32xbf16, #tpu.memory_space<vmem>>, %arg6: memref<1x32xf32, #tpu.memory_space<vmem>>, %arg7: memref<1x32xf32, #tpu.memory_space<vmem>>, %arg8: memref<1x32xf32, #tpu.memory_space<vmem>>, %arg9: memref<1x32xf32, #tpu.memory_space<vmem>>, %arg10: memref<1x32xf32, #tpu.memory_space<vmem>>, %arg11: memref<16x32xbf16, #tpu.memory_space<vmem>>, %arg12: memref<16x32xf32, #tpu.memory_space<vmem>>) attributes {dimension_semantics = [#tpu.dimension_semantics<parallel>, #tpu.dimension_semantics<arbitrary>], iteration_bounds = array<i64: 1, 1>, scalar_prefetch = 0 : i64, scratch_operands = 1 : i64, tpu.core_type = #tpu.core_type<tc>, window_params = [{transform_indices = @transform_0, window_bounds = array<i64: 16, 32>}, {transform_indices = @transform_1, window_bounds = array<i64: 32, 64>}, {transform_indices = @transform_2, window_bounds = array<i64: 1, 64>}, {transform_indices = @transform_3, window_bounds = array<i64: 64, 32>}, {pipeline_mode = #tpu.pipeline_mode<synchronous>, transform_indices = @transform_4, window_bounds = array<i64: 1, 32>}, {pipeline_mode = #tpu.pipeline_mode<synchronous>, transform_indices = @transform_5, window_bounds = array<i64: 1, 32>}, {pipeline_mode = #tpu.pipeline_mode<synchronous>, transform_indices = @transform_6, window_bounds = array<i64: 1, 32>}, {pipeline_mode = #tpu.pipeline_mode<synchronous>, transform_indices = @transform_7, window_bounds = array<i64: 1, 32>}, {pipeline_mode = #tpu.pipeline_mode<synchronous>, transform_indices = @transform_8, window_bounds = array<i64: 1, 32>}, {transform_indices = @transform_9, window_bounds = array<i64: 16, 32>}]} {
    %c0_i32 = arith.constant 0 : i32
    %0 = arith.cmpi eq, %arg1, %c0_i32 : i32
    %1 = arith.extui %0 : i1 to i32
    %c0_i32_0 = arith.constant 0 : i32
    %2 = arith.cmpi ne, %1, %c0_i32_0 : i32
    scf.if %2 {
      %cst_31 = arith.constant 0.000000e+00 : f32
      %59 = vector.broadcast %cst_31 : f32 to vector<16x32xf32>
      %c0_32 = arith.constant 0 : index
      %c0_33 = arith.constant 0 : index
      %60 = vector.load %arg12[%c0_32, %c0_33] : memref<16x32xf32, #tpu.memory_space<vmem>>, vector<16x32xf32>
      tpu.vector_store %arg12[%c0_32, %c0_33], %59 {strides = array<i32>} : memref<16x32xf32, #tpu.memory_space<vmem>>, vector<16x32xf32>,
    } else {
    }
    %c0 = arith.constant 0 : index
    %c0_1 = arith.constant 0 : index
    %3 = vector.load %arg2[%c0, %c0_1] : memref<16x32xbf16, #tpu.memory_space<vmem>>, vector<16x32xbf16>
    %c0_2 = arith.constant 0 : index
    %c0_3 = arith.constant 0 : index
    %4 = vector.load %arg3[%c0_2, %c0_3] : memref<32x64xbf16, #tpu.memory_space<vmem>>, vector<32x64xbf16>
    %cst = arith.constant dense<0.000000e+00> : vector<16x64xf32>
    %5 = tpu.matmul %3, %4, %cst {dimension_numbers = #tpu.dot_dimension_numbers<[1], [0], [0], [1], [0, 0, 1, 1], [], []>} : vector<16x32xbf16>, vector<32x64xbf16>, vector<16x64xf32> -> vector<16x64xf32>
    %c0_4 = arith.constant 0 : index
    %c0_5 = arith.constant 0 : index
    %6 = vector.load %arg4[%c0_4, %c0_5] : memref<1x64xf32, #tpu.memory_space<vmem>>, vector<1x64xf32>
    %7 = vector.broadcast %6 : vector<1x64xf32> to vector<16x64xf32>
    %8 = arith.addf %5, %7 : vector<16x64xf32>
    %cst_6 = arith.constant 5.000000e-01 : f32
    %9 = vector.broadcast %cst_6 : f32 to vector<16x64xf32>
    %10 = arith.mulf %9, %8 : vector<16x64xf32>
    %cst_7 = arith.constant 0.707106769 : f32
    %11 = vector.broadcast %cst_7 : f32 to vector<16x64xf32>
    %12 = arith.mulf %8, %11 : vector<16x64xf32>
    %cst_8 = arith.constant 0.000000e+00 : f32
    %13 = vector.broadcast %cst_8 : f32 to vector<16x64xf32>
    %14 = arith.cmpf oge, %12, %13 : vector<16x64xf32>
    %cst_9 = arith.constant 1.000000e+00 : f32
    %cst_10 = arith.constant -1.000000e+00 : f32
    %15 = vector.broadcast %cst_9 : f32 to vector<16x64xf32>
    %16 = vector.broadcast %cst_10 : f32 to vector<16x64xf32>
    %17 = arith.select %14, %15, %16 : vector<16x64xi1>, vector<16x64xf32>
    %18 = math.absf %12 : vector<16x64xf32>
    %cst_11 = arith.constant 0.327591091 : f32
    %19 = vector.broadcast %cst_11 : f32 to vector<16x64xf32>
    %20 = arith.mulf %19, %18 : vector<16x64xf32>
    %cst_12 = arith.constant 1.000000e+00 : f32
    %21 = vector.broadcast %cst_12 : f32 to vector<16x64xf32>
    %22 = arith.addf %21, %20 : vector<16x64xf32>
    %cst_13 = arith.constant 1.000000e+00 : f32
    %23 = vector.broadcast %cst_13 : f32 to vector<16x64xf32>
    %24 = arith.divf %23, %22 : vector<16x64xf32>
    %cst_14 = arith.constant 1.06140542 : f32
    %25 = vector.broadcast %cst_14 : f32 to vector<16x64xf32>
    %26 = arith.mulf %25, %24 : vector<16x64xf32>
    %cst_15 = arith.constant -1.45315206 : f32
    %27 = vector.broadcast %cst_15 : f32 to vector<16x64xf32>
    %28 = arith.addf %26, %27 : vector<16x64xf32>
    %29 = arith.mulf %28, %24 : vector<16x64xf32>
    %cst_16 = arith.constant 1.42141378 : f32
    %30 = vector.broadcast %cst_16 : f32 to vector<16x64xf32>
    %31 = arith.addf %29, %30 : vector<16x64xf32>
    %32 = arith.mulf %31, %24 : vector<16x64xf32>
    %cst_17 = arith.constant -0.284496725 : f32
    %33 = vector.broadcast %cst_17 : f32 to vector<16x64xf32>
    %34 = arith.addf %32, %33 : vector<16x64xf32>
    %35 = arith.mulf %34, %24 : vector<16x64xf32>
    %cst_18 = arith.constant 0.254829586 : f32
    %36 = vector.broadcast %cst_18 : f32 to vector<16x64xf32>
    %37 = arith.addf %35, %36 : vector<16x64xf32>
    %38 = arith.mulf %37, %24 : vector<16x64xf32>
    %cst_19 = arith.constant 0.000000e+00 : f32
    %39 = vector.broadcast %cst_19 : f32 to vector<16x64xf32>
    %40 = arith.subf %39, %18 : vector<16x64xf32>
    %41 = arith.mulf %40, %18 : vector<16x64xf32>
    %42 = math.exp %41 : vector<16x64xf32>
    %43 = arith.mulf %38, %42 : vector<16x64xf32>
    %cst_20 = arith.constant 1.000000e+00 : f32
    %44 = vector.broadcast %cst_20 : f32 to vector<16x64xf32>
    %45 = arith.subf %44, %43 : vector<16x64xf32>
    %46 = arith.mulf %17, %45 : vector<16x64xf32>
    %cst_21 = arith.constant 1.000000e+00 : f32
    %47 = vector.broadcast %cst_21 : f32 to vector<16x64xf32>
    %48 = arith.addf %47, %46 : vector<16x64xf32>
    %49 = arith.mulf %10, %48 : vector<16x64xf32>
    %50 = arith.truncf %49 : vector<16x64xf32> to vector<16x64xbf16>
    %c0_22 = arith.constant 0 : index
    %c0_23 = arith.constant 0 : index
    %51 = vector.load %arg12[%c0_22, %c0_23] : memref<16x32xf32, #tpu.memory_space<vmem>>, vector<16x32xf32>
    %c0_24 = arith.constant 0 : index
    %c0_25 = arith.constant 0 : index
    %52 = vector.load %arg5[%c0_24, %c0_25] : memref<64x32xbf16, #tpu.memory_space<vmem>>, vector<64x32xbf16>
    %cst_26 = arith.constant dense<0.000000e+00> : vector<16x32xf32>
    %53 = tpu.matmul %50, %52, %cst_26 {dimension_numbers = #tpu.dot_dimension_numbers<[1], [0], [0], [1], [0, 0, 1, 1], [], []>} : vector<16x64xbf16>, vector<64x32xbf16>, vector<16x32xf32> -> vector<16x32xf32>
    %54 = arith.addf %51, %53 : vector<16x32xf32>
    %c0_27 = arith.constant 0 : index
    %c0_28 = arith.constant 0 : index
    %55 = vector.load %arg12[%c0_27, %c0_28] : memref<16x32xf32, #tpu.memory_space<vmem>>, vector<16x32xf32>
    tpu.vector_store %arg12[%c0_27, %c0_28], %54 {strides = array<i32>} : memref<16x32xf32, #tpu.memory_space<vmem>>, vector<16x32xf32>,
    %c0_i32_29 = arith.constant 0 : i32
    %56 = arith.cmpi eq, %arg1, %c0_i32_29 : i32
    %57 = arith.extui %56 : i1 to i32
    %c0_i32_30 = arith.constant 0 : i32
    %58 = arith.cmpi ne, %57, %c0_i32_30 : i32
    scf.if %58 {
      %59 = arith.extf %3 : vector<16x32xbf16> to vector<16x32xf32>
      %c0_31 = arith.constant 0 : index
      %c0_32 = arith.constant 0 : index
      %60 = vector.load %arg12[%c0_31, %c0_32] : memref<16x32xf32, #tpu.memory_space<vmem>>, vector<16x32xf32>
      %61 = arith.addf %59, %60 : vector<16x32xf32>
      %c0_33 = arith.constant 0 : index
      %c0_34 = arith.constant 0 : index
      %62 = vector.load %arg6[%c0_33, %c0_34] : memref<1x32xf32, #tpu.memory_space<vmem>>, vector<1x32xf32>
      %63 = vector.broadcast %62 : vector<1x32xf32> to vector<16x32xf32>
      %64 = arith.addf %61, %63 : vector<16x32xf32>
      %c0_35 = arith.constant 0 : index
      %c0_36 = arith.constant 0 : index
      %65 = vector.load %arg7[%c0_35, %c0_36] : memref<1x32xf32, #tpu.memory_space<vmem>>, vector<1x32xf32>
      %c0_37 = arith.constant 0 : index
      %c0_38 = arith.constant 0 : index
      %66 = vector.load %arg8[%c0_37, %c0_38] : memref<1x32xf32, #tpu.memory_space<vmem>>, vector<1x32xf32>
      %cst_39 = arith.constant dense<0.000000e+00> : vector<16xf32>
      %67 = vector.multi_reduction <add>, %64, %cst_39 [1] : vector<16x32xf32> to vector<16xf32>
      %68 = vector.shape_cast %67 : vector<16xf32> to vector<16x1xf32>
      %cst_40 = arith.constant 3.200000e+01 : f32
      %69 = vector.broadcast %cst_40 : f32 to vector<16x1xf32>
      %70 = arith.divf %68, %69 : vector<16x1xf32>
      %71 = vector.broadcast %70 : vector<16x1xf32> to vector<16x32xf32>
      %72 = arith.subf %64, %71 : vector<16x32xf32>
      %73 = arith.mulf %72, %72 : vector<16x32xf32>
      %cst_41 = arith.constant dense<0.000000e+00> : vector<16xf32>
      %74 = vector.multi_reduction <add>, %73, %cst_41 [1] : vector<16x32xf32> to vector<16xf32>
      %75 = vector.shape_cast %74 : vector<16xf32> to vector<16x1xf32>
      %cst_42 = arith.constant 3.200000e+01 : f32
      %76 = vector.broadcast %cst_42 : f32 to vector<16x1xf32>
      %77 = arith.divf %75, %76 : vector<16x1xf32>
      %cst_43 = arith.constant 9.99999974E-6 : f32
      %78 = vector.broadcast %cst_43 : f32 to vector<16x1xf32>
      %79 = arith.addf %77, %78 : vector<16x1xf32>
      %80 = math.rsqrt %79 : vector<16x1xf32>
      %81 = vector.broadcast %80 : vector<16x1xf32> to vector<16x32xf32>
      %82 = arith.mulf %72, %81 : vector<16x32xf32>
      %83 = vector.broadcast %65 : vector<1x32xf32> to vector<16x32xf32>
      %84 = arith.mulf %82, %83 : vector<16x32xf32>
      %85 = vector.broadcast %66 : vector<1x32xf32> to vector<16x32xf32>
      %86 = arith.addf %84, %85 : vector<16x32xf32>
      %c0_44 = arith.constant 0 : index
      %c0_45 = arith.constant 0 : index
      %87 = vector.load %arg9[%c0_44, %c0_45] : memref<1x32xf32, #tpu.memory_space<vmem>>, vector<1x32xf32>
      %c0_46 = arith.constant 0 : index
      %c0_47 = arith.constant 0 : index
      %88 = vector.load %arg10[%c0_46, %c0_47] : memref<1x32xf32, #tpu.memory_space<vmem>>, vector<1x32xf32>
      %cst_48 = arith.constant dense<0.000000e+00> : vector<16xf32>
      %89 = vector.multi_reduction <add>, %86, %cst_48 [1] : vector<16x32xf32> to vector<16xf32>
      %90 = vector.shape_cast %89 : vector<16xf32> to vector<16x1xf32>
      %cst_49 = arith.constant 3.200000e+01 : f32
      %91 = vector.broadcast %cst_49 : f32 to vector<16x1xf32>
      %92 = arith.divf %90, %91 : vector<16x1xf32>
      %93 = vector.broadcast %92 : vector<16x1xf32> to vector<16x32xf32>
      %94 = arith.subf %86, %93 : vector<16x32xf32>
      %95 = arith.mulf %94, %94 : vector<16x32xf32>
      %cst_50 = arith.constant dense<0.000000e+00> : vector<16xf32>
      %96 = vector.multi_reduction <add>, %95, %cst_50 [1] : vector<16x32xf32> to vector<16xf32>
      %97 = vector.shape_cast %96 : vector<16xf32> to vector<16x1xf32>
      %cst_51 = arith.constant 3.200000e+01 : f32
      %98 = vector.broadcast %cst_51 : f32 to vector<16x1xf32>
      %99 = arith.divf %97, %98 : vector<16x1xf32>
      %cst_52 = arith.constant 9.99999974E-6 : f32
      %100 = vector.broadcast %cst_52 : f32 to vector<16x1xf32>
      %101 = arith.addf %99, %100 : vector<16x1xf32>
      %102 = math.rsqrt %101 : vector<16x1xf32>
      %103 = vector.broadcast %102 : vector<16x1xf32> to vector<16x32xf32>
      %104 = arith.mulf %94, %103 : vector<16x32xf32>
      %105 = vector.broadcast %87 : vector<1x32xf32> to vector<16x32xf32>
      %106 = arith.mulf %104, %105 : vector<16x32xf32>
      %107 = vector.broadcast %88 : vector<1x32xf32> to vector<16x32xf32>
      %108 = arith.addf %106, %107 : vector<16x32xf32>
      %109 = arith.truncf %108 : vector<16x32xf32> to vector<16x32xbf16>
      %c0_53 = arith.constant 0 : index
      %c0_54 = arith.constant 0 : index
      %110 = vector.load %arg11[%c0_53, %c0_54] : memref<16x32xbf16, #tpu.memory_space<vmem>>, vector<16x32xbf16>
      tpu.vector_store %arg11[%c0_53, %c0_54], %109 {strides = array<i32>} : memref<16x32xbf16, #tpu.memory_space<vmem>>, vector<16x32xbf16>,
    } else {
    }
    return
  }
  func.func @transform_0(%arg0: i32, %arg1: i32) -> (i32, i32) {
    %c0_i32 = arith.constant 0 : i32
    %c0_i32_0 = arith.constant 0 : i32
    return %arg0, %c0_i32 : i32, i32
  }
  func.func @transform_1(%arg0: i32, %arg1: i32) -> (i32, i32) {
    %c0_i32 = arith.constant 0 : i32
    %c0_i32_0 = arith.constant 0 : i32
    return %c0_i32, %arg1 : i32, i32
  }
  func.func @transform_2(%arg0: i32, %arg1: i32) -> (i32, i32) {
    %c0_i32 = arith.constant 0 : i32
    %c0_i32_0 = arith.constant 0 : i32
    return %c0_i32, %arg1 : i32, i32
  }
  func.func @transform_3(%arg0: i32, %arg1: i32) -> (i32, i32) {
    %c0_i32 = arith.constant 0 : i32
    %c0_i32_0 = arith.constant 0 : i32
    return %arg1, %c0_i32 : i32, i32
  }
  func.func @transform_4(%arg0: i32, %arg1: i32) -> (i32, i32) {
    %c0_i32 = arith.constant 0 : i32
    %c0_i32_0 = arith.constant 0 : i32
    %c0_i32_1 = arith.constant 0 : i32
    return %c0_i32, %c0_i32_0 : i32, i32
  }
  func.func @transform_5(%arg0: i32, %arg1: i32) -> (i32, i32) {
    %c0_i32 = arith.constant 0 : i32
    %c0_i32_0 = arith.constant 0 : i32
    %c0_i32_1 = arith.constant 0 : i32
    return %c0_i32, %c0_i32_0 : i32, i32
  }
  func.func @transform_6(%arg0: i32, %arg1: i32) -> (i32, i32) {
    %c0_i32 = arith.constant 0 : i32
    %c0_i32_0 = arith.constant 0 : i32
    %c0_i32_1 = arith.constant 0 : i32
    return %c0_i32, %c0_i32_0 : i32, i32
  }
  func.func @transform_7(%arg0: i32, %arg1: i32) -> (i32, i32) {
    %c0_i32 = arith.constant 0 : i32
    %c0_i32_0 = arith.constant 0 : i32
    %c0_i32_1 = arith.constant 0 : i32
    return %c0_i32, %c0_i32_0 : i32, i32
  }
  func.func @transform_8(%arg0: i32, %arg1: i32) -> (i32, i32) {
    %c0_i32 = arith.constant 0 : i32
    %c0_i32_0 = arith.constant 0 : i32
    %c0_i32_1 = arith.constant 0 : i32
    return %c0_i32, %c0_i32_0 : i32, i32
  }
  func.func @transform_9(%arg0: i32, %arg1: i32) -> (i32, i32) {
    %c0_i32 = arith.constant 0 : i32
    %c0_i32_0 = arith.constant 0 : i32
    return %arg0, %c0_i32 : i32, i32
  }
}

module attributes {stable_mosaic.version = 11 : i64} {
  func.func @_proj_softmax_kernel(%arg0: i32, %arg1: memref<16x32xbf16, #tpu.memory_space<vmem>>, %arg2: memref<32x64xbf16, #tpu.memory_space<vmem>>, %arg3: memref<1x64xf32, #tpu.memory_space<vmem>>, %arg4: memref<16x64xf32, #tpu.memory_space<vmem>>) attributes {dimension_semantics = [#tpu.dimension_semantics<parallel>], iteration_bounds = array<i64: 1>, scalar_prefetch = 0 : i64, scratch_operands = 0 : i64, tpu.core_type = #tpu.core_type<tc>, window_params = [{transform_indices = @transform_0, window_bounds = array<i64: 16, 32>}, {pipeline_mode = #tpu.pipeline_mode<synchronous>, transform_indices = @transform_1, window_bounds = array<i64: 32, 64>}, {pipeline_mode = #tpu.pipeline_mode<synchronous>, transform_indices = @transform_2, window_bounds = array<i64: 1, 64>}, {transform_indices = @transform_3, window_bounds = array<i64: 16, 64>}]} {
    %c0 = arith.constant 0 : index
    %c0_0 = arith.constant 0 : index
    %0 = vector.load %arg1[%c0, %c0_0] : memref<16x32xbf16, #tpu.memory_space<vmem>>, vector<16x32xbf16>
    %c0_1 = arith.constant 0 : index
    %c0_2 = arith.constant 0 : index
    %1 = vector.load %arg2[%c0_1, %c0_2] : memref<32x64xbf16, #tpu.memory_space<vmem>>, vector<32x64xbf16>
    %cst = arith.constant dense<0.000000e+00> : vector<16x64xf32>
    %2 = tpu.matmul %0, %1, %cst {dimension_numbers = #tpu.dot_dimension_numbers<[1], [0], [0], [1], [0, 0, 1, 1], [], []>} : vector<16x32xbf16>, vector<32x64xbf16>, vector<16x64xf32> -> vector<16x64xf32>
    %c0_3 = arith.constant 0 : index
    %c0_4 = arith.constant 0 : index
    %3 = vector.load %arg3[%c0_3, %c0_4] : memref<1x64xf32, #tpu.memory_space<vmem>>, vector<1x64xf32>
    %4 = vector.broadcast %3 : vector<1x64xf32> to vector<16x64xf32>
    %5 = arith.addf %2, %4 : vector<16x64xf32>
    %cst_5 = arith.constant dense<0xFF800000> : vector<16xf32>
    %6 = vector.multi_reduction <maximumf>, %5, %cst_5 [1] : vector<16x64xf32> to vector<16xf32>
    %7 = vector.shape_cast %6 : vector<16xf32> to vector<16x1xf32>
    %8 = vector.broadcast %7 : vector<16x1xf32> to vector<16x64xf32>
    %9 = arith.subf %5, %8 : vector<16x64xf32>
    %10 = math.exp %9 : vector<16x64xf32>
    %cst_6 = arith.constant dense<0.000000e+00> : vector<16xf32>
    %11 = vector.multi_reduction <add>, %10, %cst_6 [1] : vector<16x64xf32> to vector<16xf32>
    %12 = vector.shape_cast %11 : vector<16xf32> to vector<16x1xf32>
    %13 = vector.broadcast %12 : vector<16x1xf32> to vector<16x64xf32>
    %14 = arith.divf %10, %13 : vector<16x64xf32>
    %c0_7 = arith.constant 0 : index
    %c0_8 = arith.constant 0 : index
    %15 = vector.load %arg4[%c0_7, %c0_8] : memref<16x64xf32, #tpu.memory_space<vmem>>, vector<16x64xf32>
    tpu.vector_store %arg4[%c0_7, %c0_8], %14 {strides = array<i32>} : memref<16x64xf32, #tpu.memory_space<vmem>>, vector<16x64xf32>,
    return
  }
  func.func @transform_0(%arg0: i32) -> (i32, i32) {
    %c0_i32 = arith.constant 0 : i32
    %c0_i32_0 = arith.constant 0 : i32
    return %arg0, %c0_i32 : i32, i32
  }
  func.func @transform_1(%arg0: i32) -> (i32, i32) {
    %c0_i32 = arith.constant 0 : i32
    %c0_i32_0 = arith.constant 0 : i32
    %c0_i32_1 = arith.constant 0 : i32
    return %c0_i32, %c0_i32_0 : i32, i32
  }
  func.func @transform_2(%arg0: i32) -> (i32, i32) {
    %c0_i32 = arith.constant 0 : i32
    %c0_i32_0 = arith.constant 0 : i32
    %c0_i32_1 = arith.constant 0 : i32
    return %c0_i32, %c0_i32_0 : i32, i32
  }
  func.func @transform_3(%arg0: i32) -> (i32, i32) {
    %c0_i32 = arith.constant 0 : i32
    %c0_i32_0 = arith.constant 0 : i32
    return %arg0, %c0_i32 : i32, i32
  }
}

</mosaic_0001>

<bundles_post_ra>
// kernel: _lambda_.21
= control target key start
LH: loop header
LB: loop body
LE: loop exit
PB: predicated region body
PF: predicated region fallthrough
CT: control target
= control target key end

     0   :  { %v188_v1 = vmov 0.0   ;;  %vm189_vm0 = vmmov 0   ;;  %s243_s0 = inlined_call_operand.vmem [shape: bf16[16,32], index: 0, kind: input, shape index: {}]   ;;  %s244_s1 = inlined_call_operand.vmem [shape: bf16[32,64], index: 1, kind: input, shape index: {}]   ;;  %s245_s2 = inlined_call_operand.vmem [shape: f32[1,64], index: 2, kind: input, shape index: {}]   ;;  %s246_s3 = inlined_call_operand.hbm [shape: f32[16,64], index: 3, kind: output, shape index: {}]  }
   0x1   :  { %v153_v0 = vld [vmem:[%s244_s1] sm:$0xff]   ;;  %140 = vmatprep.subr.bf16.mxu0 %v188_v1  ;;  %v154_v2 = vld [vmem:[%s244_s1 + $0x8] sm:$0xff]   ;;  %144 = vmatprep.mubr.msk.bf16.mxu0 %vm189_vm0, %v188_v1 }
   0x2   :  { %141 = vmatpush3.bf16.msra.mxu0 %v153_v0 }
   0x3   :  { %142 = vmatprep.subr.bf16.mxu0 %v188_v1 }
   0x4   :  { %8 = vsyncpa [#allocation3], 0  ;;  %v155_v3 = vld [vmem:[%s243_s0] sm:$0xff]   ;;  %vm46_vm1 = vcmask 261120   ;;  %vm91_vm2 = vcmask 523264   ;;  %s190_s0 = smov [#allocation2]  }
   0x5   :  { %v132_v4 = vld [vmem:[%s245_s2] ss:$0 sm:$0xff]  ;;  %s121_s1 = sshll.u32 %s190_s0, 4  ;;  %s122_s1 = int_to_ptr.vmem [resolvable:$true] %s121_s1 }
   0x6   :  { %143 = vmatpush3.bf16.msra.mxu0 %v154_v2  ;;  %s164_s2 = scalar_lea.vmem %s122_s1, 256  ;;  %p169_p1 = scmp.lt.s32.totalorder %s122_s1, %s122_s1 }
   0x7   :  { %p165_p0 = scmp.ne.s32.totalorder %s122_s1, %s164_s2  ;;  %p170_p2 = scmp.lt.s32.totalorder %s164_s2, %s164_s2 }
   0x9   :  { %145 = vmatmul.mubr.msk.bf16.vlgmr.msra.gmra.mrb[0].mxu0 %vm46_vm1, %v155_v3  ;;  %p171_p3 = por %p170_p2, %p169_p1 }
   0xb   :  { %p172_p4 = pnand %p171_p3, %p165_p0 }
  0xdc   :  { %v84_v5 = vpop.f32.mrb[0].mxu0 }
  0xdd   :  { %v85_v6 = vadd.f32 %v132_v4, %v84_v5  ;;  %v146_v7 = vpop.f32.mrb[1].mxu0 }
  0xde   :  { %v87_v8 = vpop.f32.mrb[2].mxu0 }
  0xdf   :  { %v88_v9 = vadd.f32 %v132_v4, %v87_v8  ;;  %v147_v10 = vpop.f32.mrb[3].mxu0  ;;  %v92_v11 = vsel %vm91_vm2, %v85_v6, -inf }
  0xe0   :  { %93 = vmax.xlane.f32.xlu0 %v92_v11 }
  0xe1   :  { %v95_v12 = vsel %vm91_vm2, %v88_v9, -inf }
  0xe4   :  { %96 = vmax.xlane.f32.xlu0 %v95_v12 }
 0x16d   :  { %v94_v13 = vpop.xlane.xlu0 %93 }
 0x16e   :  { %v98_v14 = vsub.f32 %v85_v6, %v94_v13 }
 0x170   :  { %v100_v15 = vmul.f32 1.442695, %v98_v14 }
 0x171   :  { %v97_v16 = vpop.xlane.xlu0 %96 }
 0x172   :  { %156 = vpow2.f32 %v100_v15  ;;  %v99_v17 = vsub.f32 %v88_v9, %v97_v16 }
 0x174   :  { %v102_v18 = vmul.f32 1.442695, %v99_v17 }
 0x176   :  { %158 = vpow2.f32 %v102_v18 }
 0x17c   :  { %v157_v19 = vpop.eup %156 }
 0x17d   :  { %v104_v20 = vsel %vm91_vm2, %v157_v19, 0.0 }
 0x17e   :  { %105 = vadd.xlane.f32.xlu1 %v104_v20 }
 0x180   :  { %v159_v21 = vpop.eup %158 }
 0x181   :  { %v107_v22 = vsel %vm91_vm2, %v159_v21, 0.0 }
 0x182   :  { %108 = vadd.xlane.f32.xlu1 %v107_v22 }
 0x20b   :  { %v106_v23 = vpop.xlane.xlu1 %105 }
 0x20c   :  { %160 = vrcp.f32 %v106_v23 }
 0x20f   :  { %v109_v24 = vpop.xlane.xlu1 %108 }
 0x210   :  { %162 = vrcp.f32 %v109_v24 }
 0x216   :  { %v161_v25 = vpop.eup %160 }
 0x217   :  { %v111_v26 = vmul.f32 %v161_v25, %v157_v19 }
 0x219   :  { %114 = vst.msk [vmem:[#allocation2] sm:$0xff] %vm91_vm2, %v111_v26 }
 0x21a   :  { %v163_v27 = vpop.eup %162 }
 0x21b   :  { %v113_v28 = vmul.f32 %v163_v27, %v159_v21 }
 0x21d   :  { %115 = vst.msk [vmem:[#allocation2 + $0x8] sm:$0xff] %vm91_vm2, %v113_v28 }
 0x21e   :  { %175 = shalt.err (!%p172_p4)
}
 0x21f   :  { %s176_s22 = scalar_lea.hbm %s246_s3, 256 }
 0x220   :  { %p177_p5 = scmp.ne.s32.totalorder %s246_s3, %s176_s22  ;;  %p180_p6 = scmp.lt.u32.totalorder %s176_s22, %s246_s3 }
 0x222   :  { %p182_p7 = pnand %p180_p6, %p177_p5 }
 0x224   :  { %185 = shalt.err (!%p182_p7)
}
 0x225   :  { %s191_s27 = smov 128   ;;  %s192_s28 = smov 8  }
 0x226   :  { %127 = dma.vmem_to_hbm [thread:$0]  %s122_s1, 256, %s246_s3, [#allocation3], %s191_s27, %s191_s27, %s192_s28  }
 0x227   :  { %186 = dma.done.wait [#allocation3], 256  }
 0x228   :  { %187 = vsyncadd [#allocation3], 4294967040 }
 0x229   :  { %131 = vsyncpa [#allocation3], 1 }

// kernel: _lambda_.12
= control target key start
LH: loop header
LB: loop body
LE: loop exit
PB: predicated region body
PF: predicated region fallthrough
CT: control target
= control target key end

     0   :  { %vm37_vm0 = vcmask 261120   ;;  %v399_v0 = vmov 0.0   ;;  %vm400_vm1 = vmmov 0   ;;  %v401_v53 = vmov -1.0   ;;  %s505_s7 = inlined_call_operand.vmem [shape: f32[1,32], index: 7, kind: input, shape index: {}, may-alias: {5,7}]   ;;  %s506_s8 = inlined_call_operand.vmem [shape: f32[1,32], index: 8, kind: input, shape index: {}, may-alias: {4,6,8}]   ;;  %s507_s1 = inlined_call_operand.vmem [shape: bf16[32,64], index: 1, kind: input, shape index: {}]   ;;  %s508_s0 = inlined_call_operand.vmem [shape: bf16[16,32], index: 0, kind: input, shape index: {}]   ;;  %s509_s3 = inlined_call_operand.vmem [shape: bf16[64,32], index: 3, kind: input, shape index: {}]   ;;  %s510_s2 = inlined_call_operand.vmem [shape: f32[1,64], index: 2, kind: input, shape index: {}]   ;;  %s511_s4 = inlined_call_operand.vmem [shape: f32[1,32], index: 4, kind: input, shape index: {}, may-alias: {4,6,8}]   ;;  %s512_s5 = inlined_call_operand.vmem [shape: f32[1,32], index: 5, kind: input, shape index: {}, may-alias: {5,7}]   ;;  %s513_s6 = inlined_call_operand.vmem [shape: f32[1,32], index: 6, kind: input, shape index: {}, may-alias: {4,6,8}]   ;;  %s514_s9 = inlined_call_operand.vmem [shape: bf16[16,32], index: 9, kind: output, shape index: {}]  }
   0x1   :  { %356 = vmatprep.subr.bf16.mxu0 %v399_v0  ;;  %v379_v1 = vld [vmem:[%s507_s1] sm:$0xff]   ;;  %360 = vmatprep.mubr.msk.bf16.mxu0 %vm400_vm1, %v399_v0  ;;  %38 = vst.msk [vmem:[#allocation2] sm:$0xff] %vm37_vm0, %v399_v0  ;;  %39 = vst.msk [vmem:[#allocation2 + $0x8] sm:$0xff] %vm37_vm0, %v399_v0  ;;  %v380_v2 = vld [vmem:[%s507_s1 + $0x8] sm:$0xff]   ;;  %vm204_vm4 = vcmask 523264   ;;  %vm324_vm5 = vcmask 257024  }
   0x2   :  { %364 = vmatprep.subr.bf16.mxu1 %v399_v0  ;;  %372 = vmatprep.mubr.msk.bf16.mxu1 %vm400_vm1, %v399_v0  ;;  %v463_v3 = vld [vmem:[%s508_s0] sm:$0xff]   ;;  %v383_v5 = vld [vmem:[%s509_s3 + $0x8] sm:$0xff]   ;;  %v384_v6 = vld [vmem:[%s509_s3 + $0x10] sm:$0xff]  }
   0x3   :  { %357 = vmatpush3.bf16.msra.mxu0 %v379_v1  ;;  %v382_v4 = vld [vmem:[%s509_s3] sm:$0xff]   ;;  %v385_v7 = vld [vmem:[%s509_s3 + $0x18] sm:$0xff]  }
   0x4   :  { %358 = vmatprep.subr.bf16.mxu0 %v399_v0  ;;  %365 = vmatpush3.bf16.msra.mxu1 %v382_v4  ;;  %v331_v8 = vld [vmem:[%s510_s2] ss:$0 sm:$0xff] }
   0x5   :  { %366 = vmatprep.subr.bf16.mxu1 %v399_v0 }
   0x7   :  { %359 = vmatpush3.bf16.msra.mxu0 %v380_v2 }
   0x8   :  { %367 = vmatpush3.bf16.msra.mxu1 %v383_v5  ;;  %v170_v4 = vld [vmem:[#allocation2] sm:$0xff] }
   0x9   :  { %368 = vmatprep.subr.bf16.mxu1 %v399_v0 }
   0xa   :  { %361 = vmatmul.mubr.msk.bf16.vlgmr.msra.gmra.mrb[0].mxu0 %vm37_vm0, %v463_v3 }
   0xc   :  { %369 = vmatpush3.bf16.msra.mxu1 %v384_v6  ;;  %v171_v6 = vld [vmem:[#allocation2 + $0x8] sm:$0xff] }
   0xd   :  { %370 = vmatprep.subr.bf16.mxu1 %v399_v0 }
  0x10   :  { %371 = vmatpush3.bf16.msra.mxu1 %v385_v7 }
  0xdd   :  { %v108_v9 = vpop.f32.mrb[0].mxu0 }
  0xde   :  { %v109_v10 = vadd.f32 %v331_v8, %v108_v9  ;;  %v362_v11 = vpop.f32.mrb[1].mxu0 }
  0xdf   :  { %v111_v12 = vpop.f32.mrb[2].mxu0 }
  0xe0   :  { %v117_v13 = vmul.f32 0.70710677, %v109_v10  ;;  %v112_v14 = vadd.f32 %v331_v8, %v111_v12  ;;  %v363_v15 = vpop.f32.mrb[3].mxu0  ;;  %v115_v61 = vmul.f32 0.5, %v109_v10  ;;  %v256_v10 = vunpack.c.l.bf16 %v463_v3 }
  0xe1   :  { %v341_v15 = vld [vmem:[%s511_s4] ss:$0 sm:$0xff] }
  0xe2   :  { %v123_v16 = vand.u32 2147483647, %v117_v13  ;;  %v118_v17 = vmul.f32 0.70710677, %v112_v14  ;;  %vm119_vm2 = vcmp.ge.f32.partialorder %v117_v13, 0.0  ;;  %v116_v62 = vmul.f32 0.5, %v112_v14 }
  0xe3   :  { %v121_v54 = vsel %vm119_vm2, 1.0, %v401_v53  ;;  %v257_v13 = vunpack.c.h.bf16 %v463_v3 }
  0xe4   :  { %v125_v18 = vmul.f32 0.3275911, %v123_v16  ;;  %v124_v19 = vand.u32 2147483647, %v118_v17  ;;  %v151_v23 = vsub.f32 0.0, %v123_v16  ;;  %vm120_vm3 = vcmp.ge.f32.partialorder %v118_v17, 0.0 }
  0xe5   :  { %v122_v58 = vsel %vm120_vm3, 1.0, %v401_v53 }
  0xe6   :  { %v127_v20 = vadd.f32 1.0, %v125_v18  ;;  %v126_v21 = vmul.f32 0.3275911, %v124_v19  ;;  %v152_v24 = vsub.f32 0.0, %v124_v19  ;;  %v153_v26 = vmul.f32 %v151_v23, %v123_v16 }
  0xe8   :  { %387 = vrcp.f32 %v127_v20  ;;  %v128_v22 = vadd.f32 1.0, %v126_v21  ;;  %v154_v30 = vmul.f32 %v152_v24, %v124_v19  ;;  %v155_v31 = vmul.f32 1.442695, %v153_v26 }
  0xea   :  { %389 = vrcp.f32 %v128_v22  ;;  %v157_v36 = vmul.f32 1.442695, %v154_v30 }
  0xeb   :  { %391 = vpow2.f32 %v155_v31 }
  0xec   :  { %393 = vpow2.f32 %v157_v36 }
  0xf2   :  { %v388_v25 = vpop.eup %387 }
  0xf3   :  { %v133_v27 = vmul.f32 1.0614054, %v388_v25 }
  0xf4   :  { %v390_v28 = vpop.eup %389 }
  0xf5   :  { %v135_v29 = vadd.f32 -1.4531521, %v133_v27  ;;  %v134_v32 = vmul.f32 1.0614054, %v390_v28  ;;  %v392_v47 = vpop.eup %391 }
  0xf6   :  { %v394_v51 = vpop.eup %393 }
  0xf7   :  { %v137_v33 = vmul.f32 %v388_v25, %v135_v29  ;;  %v136_v34 = vadd.f32 -1.4531521, %v134_v32 }
  0xf9   :  { %v139_v35 = vadd.f32 1.4214138, %v137_v33  ;;  %v138_v37 = vmul.f32 %v390_v28, %v136_v34 }
  0xfb   :  { %v141_v38 = vmul.f32 %v388_v25, %v139_v35  ;;  %v140_v39 = vadd.f32 1.4214138, %v138_v37 }
  0xfd   :  { %v143_v40 = vadd.f32 -0.28449672, %v141_v38  ;;  %v142_v41 = vmul.f32 %v390_v28, %v140_v39  ;;  %v342_v39 = vld [vmem:[%s512_s5] ss:$0 sm:$0xff] }
  0xff   :  { %v145_v42 = vmul.f32 %v388_v25, %v143_v40  ;;  %v144_v43 = vadd.f32 -0.28449672, %v142_v41  ;;  %v343_v41 = vld [vmem:[%s513_s6] ss:$0 sm:$0xff] }
 0x101   :  { %v147_v44 = vadd.f32 0.2548296, %v145_v42  ;;  %v146_v45 = vmul.f32 %v390_v28, %v144_v43 }
 0x103   :  { %v149_v46 = vmul.f32 %v388_v25, %v147_v44  ;;  %v148_v48 = vadd.f32 0.2548296, %v146_v45 }
 0x105   :  { %v159_v49 = vmul.f32 %v392_v47, %v149_v46  ;;  %v150_v50 = vmul.f32 %v390_v28, %v148_v48 }
 0x107   :  { %v161_v52 = vsub.f32 1.0, %v159_v49  ;;  %v160_v55 = vmul.f32 %v394_v51, %v150_v50 }
 0x109   :  { %v163_v56 = vmul.f32 %v161_v52, %v121_v54  ;;  %v162_v57 = vsub.f32 1.0, %v160_v55 }
 0x10b   :  { %v165_v59 = vadd.f32 1.0, %v163_v56  ;;  %v164_v60 = vmul.f32 %v162_v57, %v122_v58 }
 0x10d   :  { %v166_v63 = vadd.f32 1.0, %v164_v60  ;;  %v167_v0 = vmul.f32 %v165_v59, %v115_v61 }
 0x10f   :  { %v168_v1 = vmul.f32 %v166_v63, %v116_v62 }
 0x111   :  { %v169_v2 = vpack.c.bf16 %v168_v1, %v167_v0 }
 0x113   :  { %373 = vmatmul.mubr.msk.bf16.vlgmr.msra.gmra.mrb[0].mxu1 %vm204_vm4, %v169_v2 }
 0x1e6   :  { %v242_v5 = vpop.f32.mrb[0].mxu1 }
 0x1e7   :  { %v249_v7 = vadd.f32 %v242_v5, %v170_v4  ;;  %v374_v8 = vpop.f32.mrb[1].mxu1 }
 0x1e8   :  { %v245_v9 = vpop.f32.mrb[2].mxu1 }
 0x1e9   :  { %251 = vst.msk [vmem:[#allocation2] sm:$0xff] %vm37_vm0, %v249_v7  ;;  %v250_v11 = vadd.f32 %v245_v9, %v171_v6  ;;  %v375_v12 = vpop.f32.mrb[3].mxu1 }
 0x1eb   :  { %252 = vst.msk [vmem:[#allocation2 + $0x8] sm:$0xff] %vm37_vm0, %v250_v11 }
 0x1f0   :  { %v258_v14 = vld [vmem:[#allocation2] sm:$0xff] }
 0x1f1   :  { %v260_v16 = vadd.f32 %v258_v14, %v256_v10 }
 0x1f2   :  { %v259_v17 = vld [vmem:[#allocation2 + $0x8] sm:$0xff] }
 0x1f3   :  { %v269_v18 = vadd.f32 %v341_v15, %v260_v16  ;;  %v261_v19 = vadd.f32 %v259_v17, %v257_v13 }
 0x1f5   :  { %v273_v20 = vsel %vm37_vm0, %v269_v18, 0.0  ;;  %v270_v21 = vadd.f32 %v341_v15, %v261_v19 }
 0x1f6   :  { %274 = vadd.xlane.f32.xlu0 %v273_v20 }
 0x1f7   :  { %v276_v22 = vsel %vm37_vm0, %v270_v21, 0.0 }
 0x1fa   :  { %277 = vadd.xlane.f32.xlu0 %v276_v22 }
 0x283   :  { %v275_v23 = vpop.xlane.xlu0 %274 }
 0x284   :  { %v280_v24 = vmul.f32 0.03125, %v275_v23 }
 0x286   :  { %v282_v25 = vsub.f32 %v269_v18, %v280_v24 }
 0x287   :  { %v278_v3 = vpop.xlane.xlu0 %277 }
 0x288   :  { %v281_v26 = vmul.f32 0.03125, %v278_v3  ;;  %v284_v27 = vmul.f32 %v282_v25, %v282_v25 }
 0x28a   :  { %v283_v28 = vsub.f32 %v270_v21, %v281_v26  ;;  %v286_v29 = vsel %vm37_vm0, %v284_v27, 0.0 }
 0x28b   :  { %287 = vadd.xlane.f32.xlu1 %v286_v29 }
 0x28c   :  { %v285_v30 = vmul.f32 %v283_v28, %v283_v28 }
 0x28e   :  { %v289_v31 = vsel %vm37_vm0, %v285_v30, 0.0 }
 0x28f   :  { %290 = vadd.xlane.f32.xlu1 %v289_v31 }
 0x318   :  { %v288_v32 = vpop.xlane.xlu1 %287 }
 0x319   :  { %v292_v33 = vmul.f32 0.03125, %v288_v32 }
 0x31b   :  { %v294_v34 = vadd.f32 1e-05, %v292_v33 }
 0x31c   :  { %v291_v35 = vpop.xlane.xlu1 %290 }
 0x31d   :  { %395 = vrsqrt.f32 %v294_v34  ;;  %v293_v36 = vmul.f32 0.03125, %v291_v35 }
 0x31f   :  { %v295_v37 = vadd.f32 1e-05, %v293_v36 }
 0x321   :  { %397 = vrsqrt.f32 %v295_v37 }
 0x327   :  { %v396_v38 = vpop.eup %395 }
 0x328   :  { %v298_v40 = vmul.f32 %v396_v38, %v282_v25 }
 0x32a   :  { %v306_v42 = vmul.f32 %v342_v39, %v298_v40 }
 0x32b   :  { %v398_v43 = vpop.eup %397 }
 0x32c   :  { %v314_v44 = vadd.f32 %v343_v41, %v306_v42  ;;  %v299_v45 = vmul.f32 %v398_v43, %v283_v28 }
 0x32e   :  { %v346_v46 = vpack.c.bf16 %v314_v44, %v314_v44  ;;  %v307_v47 = vmul.f32 %v342_v39, %v299_v45 }
 0x330   :  { %325 = vst.msk [vmem:[%s514_s9] sm:$0xf] %vm324_vm5, %v346_v46  ;;  %v315_v48 = vadd.f32 %v343_v41, %v307_v47 }
 0x332   :  { %v347_v49 = vpack.c.bf16 %v315_v48, %v315_v48 }
 0x334   :  { %326 = vst.msk [vmem:[%s514_s9 + $0x4] sm:$0xf] %vm324_vm5, %v347_v49 }

// kernel: _lambda_.14
= control target key start
LH: loop header
LB: loop body
LE: loop exit
PB: predicated region body
PF: predicated region fallthrough
CT: control target
= control target key end

     0   :  { %vm37_vm0 = vcmask 261120   ;;  %v449_v0 = vmov 0.0   ;;  %vm450_vm1 = vmmov 0   ;;  %v451_v53 = vmov -1.0   ;;  %s565_s1 = inlined_call_operand.vmem [shape: bf16[32,64], index: 1, kind: input, shape index: {}]   ;;  %s566_s0 = inlined_call_operand.vmem [shape: bf16[16,32], index: 0, kind: input, shape index: {}]   ;;  %s567_s3 = inlined_call_operand.vmem [shape: bf16[64,32], index: 3, kind: input, shape index: {}]   ;;  %s568_s2 = inlined_call_operand.vmem [shape: f32[1,64], index: 2, kind: input, shape index: {}]   ;;  %s569_s4 = inlined_call_operand.vmem [shape: f32[1,32], index: 4, kind: input, shape index: {}, may-alias: {4,6,8}]   ;;  %s570_s5 = inlined_call_operand.vmem [shape: f32[1,32], index: 5, kind: input, shape index: {}, may-alias: {5,7}]   ;;  %s571_s6 = inlined_call_operand.vmem [shape: f32[1,32], index: 6, kind: input, shape index: {}, may-alias: {4,6,8}]   ;;  %s572_s7 = inlined_call_operand.vmem [shape: f32[1,32], index: 7, kind: input, shape index: {}, may-alias: {5,7}]   ;;  %s573_s8 = inlined_call_operand.vmem [shape: f32[1,32], index: 8, kind: input, shape index: {}, may-alias: {4,6,8}]   ;;  %s574_s9 = inlined_call_operand.vmem [shape: bf16[16,32], index: 9, kind: output, shape index: {}]  }
   0x1   :  { %402 = vmatprep.subr.bf16.mxu0 %v449_v0  ;;  %v425_v1 = vld [vmem:[%s565_s1] sm:$0xff]   ;;  %406 = vmatprep.mubr.msk.bf16.mxu0 %vm450_vm1, %v449_v0  ;;  %38 = vst.msk [vmem:[#allocation2] sm:$0xff] %vm37_vm0, %v449_v0  ;;  %39 = vst.msk [vmem:[#allocation2 + $0x8] sm:$0xff] %vm37_vm0, %v449_v0  ;;  %v426_v2 = vld [vmem:[%s565_s1 + $0x8] sm:$0xff]   ;;  %vm204_vm4 = vcmask 523264   ;;  %vm368_vm5 = vcmask 257024  }
   0x2   :  { %410 = vmatprep.subr.bf16.mxu1 %v449_v0  ;;  %418 = vmatprep.mubr.msk.bf16.mxu1 %vm450_vm1, %v449_v0  ;;  %v513_v3 = vld [vmem:[%s566_s0] sm:$0xff]   ;;  %v429_v5 = vld [vmem:[%s567_s3 + $0x8] sm:$0xff]   ;;  %v430_v6 = vld [vmem:[%s567_s3 + $0x10] sm:$0xff]  }
   0x3   :  { %403 = vmatpush3.bf16.msra.mxu0 %v425_v1  ;;  %v428_v4 = vld [vmem:[%s567_s3] sm:$0xff]   ;;  %v431_v7 = vld [vmem:[%s567_s3 + $0x18] sm:$0xff]  }
   0x4   :  { %404 = vmatprep.subr.bf16.mxu0 %v449_v0  ;;  %411 = vmatpush3.bf16.msra.mxu1 %v428_v4  ;;  %v375_v8 = vld [vmem:[%s568_s2] ss:$0 sm:$0xff] }
   0x5   :  { %412 = vmatprep.subr.bf16.mxu1 %v449_v0 }
   0x7   :  { %405 = vmatpush3.bf16.msra.mxu0 %v426_v2 }
   0x8   :  { %413 = vmatpush3.bf16.msra.mxu1 %v429_v5  ;;  %v170_v4 = vld [vmem:[#allocation2] sm:$0xff] }
   0x9   :  { %414 = vmatprep.subr.bf16.mxu1 %v449_v0 }
   0xa   :  { %407 = vmatmul.mubr.msk.bf16.vlgmr.msra.gmra.mrb[0].mxu0 %vm37_vm0, %v513_v3 }
   0xc   :  { %415 = vmatpush3.bf16.msra.mxu1 %v430_v6  ;;  %v171_v6 = vld [vmem:[#allocation2 + $0x8] sm:$0xff] }
   0xd   :  { %416 = vmatprep.subr.bf16.mxu1 %v449_v0 }
  0x10   :  { %417 = vmatpush3.bf16.msra.mxu1 %v431_v7 }
  0xdd   :  { %v108_v9 = vpop.f32.mrb[0].mxu0 }
  0xde   :  { %v109_v10 = vadd.f32 %v375_v8, %v108_v9  ;;  %v408_v11 = vpop.f32.mrb[1].mxu0 }
  0xdf   :  { %v111_v12 = vpop.f32.mrb[2].mxu0 }
  0xe0   :  { %v117_v13 = vmul.f32 0.70710677, %v109_v10  ;;  %v112_v14 = vadd.f32 %v375_v8, %v111_v12  ;;  %v409_v15 = vpop.f32.mrb[3].mxu0  ;;  %v115_v61 = vmul.f32 0.5, %v109_v10  ;;  %v256_v10 = vunpack.c.l.bf16 %v513_v3 }
  0xe1   :  { %v385_v15 = vld [vmem:[%s569_s4] ss:$0 sm:$0xff] }
  0xe2   :  { %v123_v16 = vand.u32 2147483647, %v117_v13  ;;  %v118_v17 = vmul.f32 0.70710677, %v112_v14  ;;  %vm119_vm2 = vcmp.ge.f32.partialorder %v117_v13, 0.0  ;;  %v116_v62 = vmul.f32 0.5, %v112_v14 }
  0xe3   :  { %v121_v54 = vsel %vm119_vm2, 1.0, %v451_v53  ;;  %v257_v13 = vunpack.c.h.bf16 %v513_v3 }
  0xe4   :  { %v125_v18 = vmul.f32 0.3275911, %v123_v16  ;;  %v124_v19 = vand.u32 2147483647, %v118_v17  ;;  %v151_v23 = vsub.f32 0.0, %v123_v16  ;;  %vm120_vm3 = vcmp.ge.f32.partialorder %v118_v17, 0.0 }
  0xe5   :  { %v122_v58 = vsel %vm120_vm3, 1.0, %v451_v53 }
  0xe6   :  { %v127_v20 = vadd.f32 1.0, %v125_v18  ;;  %v126_v21 = vmul.f32 0.3275911, %v124_v19  ;;  %v152_v24 = vsub.f32 0.0, %v124_v19  ;;  %v153_v26 = vmul.f32 %v151_v23, %v123_v16 }
  0xe8   :  { %433 = vrcp.f32 %v127_v20  ;;  %v128_v22 = vadd.f32 1.0, %v126_v21  ;;  %v154_v30 = vmul.f32 %v152_v24, %v124_v19  ;;  %v155_v31 = vmul.f32 1.442695, %v153_v26 }
  0xea   :  { %435 = vrcp.f32 %v128_v22  ;;  %v157_v36 = vmul.f32 1.442695, %v154_v30 }
  0xeb   :  { %437 = vpow2.f32 %v155_v31 }
  0xec   :  { %439 = vpow2.f32 %v157_v36 }
  0xf2   :  { %v434_v25 = vpop.eup %433 }
  0xf3   :  { %v133_v27 = vmul.f32 1.0614054, %v434_v25 }
  0xf4   :  { %v436_v28 = vpop.eup %435 }
  0xf5   :  { %v135_v29 = vadd.f32 -1.4531521, %v133_v27  ;;  %v134_v32 = vmul.f32 1.0614054, %v436_v28  ;;  %v438_v47 = vpop.eup %437 }
  0xf6   :  { %v440_v51 = vpop.eup %439 }
  0xf7   :  { %v137_v33 = vmul.f32 %v434_v25, %v135_v29  ;;  %v136_v34 = vadd.f32 -1.4531521, %v134_v32 }
  0xf9   :  { %v139_v35 = vadd.f32 1.4214138, %v137_v33  ;;  %v138_v37 = vmul.f32 %v436_v28, %v136_v34 }
  0xfb   :  { %v141_v38 = vmul.f32 %v434_v25, %v139_v35  ;;  %v140_v39 = vadd.f32 1.4214138, %v138_v37 }
  0xfd   :  { %v143_v40 = vadd.f32 -0.28449672, %v141_v38  ;;  %v142_v41 = vmul.f32 %v436_v28, %v140_v39  ;;  %v386_v39 = vld [vmem:[%s570_s5] ss:$0 sm:$0xff] }
  0xff   :  { %v145_v42 = vmul.f32 %v434_v25, %v143_v40  ;;  %v144_v43 = vadd.f32 -0.28449672, %v142_v41  ;;  %v387_v41 = vld [vmem:[%s571_s6] ss:$0 sm:$0xff] }
 0x101   :  { %v147_v44 = vadd.f32 0.2548296, %v145_v42  ;;  %v146_v45 = vmul.f32 %v436_v28, %v144_v43 }
 0x103   :  { %v149_v46 = vmul.f32 %v434_v25, %v147_v44  ;;  %v148_v48 = vadd.f32 0.2548296, %v146_v45 }
 0x105   :  { %v159_v49 = vmul.f32 %v438_v47, %v149_v46  ;;  %v150_v50 = vmul.f32 %v436_v28, %v148_v48 }
 0x107   :  { %v161_v52 = vsub.f32 1.0, %v159_v49  ;;  %v160_v55 = vmul.f32 %v440_v51, %v150_v50 }
 0x109   :  { %v163_v56 = vmul.f32 %v161_v52, %v121_v54  ;;  %v162_v57 = vsub.f32 1.0, %v160_v55 }
 0x10b   :  { %v165_v59 = vadd.f32 1.0, %v163_v56  ;;  %v164_v60 = vmul.f32 %v162_v57, %v122_v58 }
 0x10d   :  { %v166_v63 = vadd.f32 1.0, %v164_v60  ;;  %v167_v0 = vmul.f32 %v165_v59, %v115_v61 }
 0x10f   :  { %v168_v1 = vmul.f32 %v166_v63, %v116_v62 }
 0x111   :  { %v169_v2 = vpack.c.bf16 %v168_v1, %v167_v0 }
 0x113   :  { %419 = vmatmul.mubr.msk.bf16.vlgmr.msra.gmra.mrb[0].mxu1 %vm204_vm4, %v169_v2 }
 0x1e6   :  { %v242_v5 = vpop.f32.mrb[0].mxu1 }
 0x1e7   :  { %v249_v7 = vadd.f32 %v242_v5, %v170_v4  ;;  %v420_v8 = vpop.f32.mrb[1].mxu1  ;;  %v388_v4 = vld [vmem:[%s572_s7] ss:$0 sm:$0xff] }
 0x1e8   :  { %v245_v9 = vpop.f32.mrb[2].mxu1 }
 0x1e9   :  { %251 = vst.msk [vmem:[#allocation2] sm:$0xff] %vm37_vm0, %v249_v7  ;;  %v250_v11 = vadd.f32 %v245_v9, %v171_v6  ;;  %v421_v12 = vpop.f32.mrb[3].mxu1  ;;  %v389_v6 = vld [vmem:[%s573_s8] ss:$0 sm:$0xff] }
 0x1eb   :  { %252 = vst.msk [vmem:[#allocation2 + $0x8] sm:$0xff] %vm37_vm0, %v250_v11 }
 0x1f0   :  { %v258_v14 = vld [vmem:[#allocation2] sm:$0xff] }
 0x1f1   :  { %v260_v16 = vadd.f32 %v258_v14, %v256_v10 }
 0x1f2   :  { %v259_v17 = vld [vmem:[#allocation2 + $0x8] sm:$0xff] }
 0x1f3   :  { %v269_v18 = vadd.f32 %v385_v15, %v260_v16  ;;  %v261_v19 = vadd.f32 %v259_v17, %v257_v13 }
 0x1f5   :  { %v273_v20 = vsel %vm37_vm0, %v269_v18, 0.0  ;;  %v270_v21 = vadd.f32 %v385_v15, %v261_v19 }
 0x1f6   :  { %274 = vadd.xlane.f32.xlu0 %v273_v20 }
 0x1f7   :  { %v276_v22 = vsel %vm37_vm0, %v270_v21, 0.0 }
 0x1fa   :  { %277 = vadd.xlane.f32.xlu0 %v276_v22 }
 0x283   :  { %v275_v23 = vpop.xlane.xlu0 %274 }
 0x284   :  { %v280_v24 = vmul.f32 0.03125, %v275_v23 }
 0x286   :  { %v282_v25 = vsub.f32 %v269_v18, %v280_v24 }
 0x287   :  { %v278_v3 = vpop.xlane.xlu0 %277 }
 0x288   :  { %v281_v26 = vmul.f32 0.03125, %v278_v3  ;;  %v284_v27 = vmul.f32 %v282_v25, %v282_v25 }
 0x28a   :  { %v283_v28 = vsub.f32 %v270_v21, %v281_v26  ;;  %v286_v29 = vsel %vm37_vm0, %v284_v27, 0.0 }
 0x28b   :  { %287 = vadd.xlane.f32.xlu1 %v286_v29 }
 0x28c   :  { %v285_v30 = vmul.f32 %v283_v28, %v283_v28 }
 0x28e   :  { %v289_v31 = vsel %vm37_vm0, %v285_v30, 0.0 }
 0x28f   :  { %290 = vadd.xlane.f32.xlu1 %v289_v31 }
 0x318   :  { %v288_v32 = vpop.xlane.xlu1 %287 }
 0x319   :  { %v292_v33 = vmul.f32 0.03125, %v288_v32 }
 0x31b   :  { %v294_v34 = vadd.f32 1e-05, %v292_v33 }
 0x31c   :  { %v291_v35 = vpop.xlane.xlu1 %290 }
 0x31d   :  { %441 = vrsqrt.f32 %v294_v34  ;;  %v293_v36 = vmul.f32 0.03125, %v291_v35 }
 0x31f   :  { %v295_v37 = vadd.f32 1e-05, %v293_v36 }
 0x321   :  { %443 = vrsqrt.f32 %v295_v37 }
 0x327   :  { %v442_v38 = vpop.eup %441 }
 0x328   :  { %v298_v40 = vmul.f32 %v442_v38, %v282_v25 }
 0x32a   :  { %v306_v42 = vmul.f32 %v386_v39, %v298_v40 }
 0x32b   :  { %v444_v43 = vpop.eup %443 }
 0x32c   :  { %v314_v44 = vadd.f32 %v387_v41, %v306_v42  ;;  %v299_v45 = vmul.f32 %v444_v43, %v283_v28 }
 0x32e   :  { %v318_v46 = vsel %vm37_vm0, %v314_v44, 0.0  ;;  %v307_v47 = vmul.f32 %v386_v39, %v299_v45 }
 0x32f   :  { %319 = vadd.xlane.f32.xlu0 %v318_v46 }
 0x330   :  { %v315_v48 = vadd.f32 %v387_v41, %v307_v47 }
 0x332   :  { %v321_v49 = vsel %vm37_vm0, %v315_v48, 0.0 }
 0x333   :  { %322 = vadd.xlane.f32.xlu1 %v321_v49 }
 0x3bc   :  { %v320_v50 = vpop.xlane.xlu0 %319 }
 0x3bd   :  { %v324_v51 = vmul.f32 0.03125, %v320_v50 }
 0x3bf   :  { %v326_v52 = vsub.f32 %v314_v44, %v324_v51 }
 0x3c0   :  { %v323_v53 = vpop.xlane.xlu1 %322 }
 0x3c1   :  { %v325_v54 = vmul.f32 0.03125, %v323_v53  ;;  %v328_v55 = vmul.f32 %v326_v52, %v326_v52 }
 0x3c3   :  { %v327_v56 = vsub.f32 %v315_v48, %v325_v54  ;;  %v330_v57 = vsel %vm37_vm0, %v328_v55, 0.0 }
 0x3c4   :  { %331 = vadd.xlane.f32.xlu0 %v330_v57 }
 0x3c5   :  { %v329_v58 = vmul.f32 %v327_v56, %v327_v56 }
 0x3c7   :  { %v333_v59 = vsel %vm37_vm0, %v329_v58, 0.0 }
 0x3c8   :  { %334 = vadd.xlane.f32.xlu1 %v333_v59 }
 0x451   :  { %v332_v60 = vpop.xlane.xlu0 %331 }
 0x452   :  { %v336_v61 = vmul.f32 0.03125, %v332_v60 }
 0x454   :  { %v338_v62 = vadd.f32 1e-05, %v336_v61 }
 0x455   :  { %v335_v63 = vpop.xlane.xlu1 %334 }
 0x456   :  { %445 = vrsqrt.f32 %v338_v62  ;;  %v337_v0 = vmul.f32 0.03125, %v335_v63 }
 0x458   :  { %v339_v1 = vadd.f32 1e-05, %v337_v0 }
 0x45a   :  { %447 = vrsqrt.f32 %v339_v1 }
 0x460   :  { %v446_v2 = vpop.eup %445 }
 0x461   :  { %v342_v5 = vmul.f32 %v446_v2, %v326_v52 }
 0x463   :  { %v350_v7 = vmul.f32 %v388_v4, %v342_v5 }
 0x464   :  { %v448_v8 = vpop.eup %447 }
 0x465   :  { %v358_v9 = vadd.f32 %v389_v6, %v350_v7  ;;  %v343_v11 = vmul.f32 %v448_v8, %v327_v56 }
 0x467   :  { %v392_v12 = vpack.c.bf16 %v358_v9, %v358_v9  ;;  %v351_v10 = vmul.f32 %v388_v4, %v343_v11 }
 0x469   :  { %369 = vst.msk [vmem:[%s574_s9] sm:$0xf] %vm368_vm5, %v392_v12  ;;  %v359_v13 = vadd.f32 %v389_v6, %v351_v10 }
 0x46b   :  { %v393_v14 = vpack.c.bf16 %v359_v13, %v359_v13 }
 0x46d   :  { %370 = vst.msk [vmem:[%s574_s9 + $0x4] sm:$0xf] %vm368_vm5, %v393_v14 }

// kernel: _lambda_.11
= control target key start
LH: loop header
LB: loop body
LE: loop exit
PB: predicated region body
PF: predicated region fallthrough
CT: control target
= control target key end

     0   :  { %s2262_s13 = smov 0   ;;  %s2264_s14 = smov 0   ;;  %s2557_s0 = inlined_call_operand.vmem [shape: bf16[2,8,32], index: 0, kind: input, shape index: {}, may-alias: {0,1}]   ;;  %s2558_s1 = inlined_call_operand.vmem [shape: bf16[2,8,32], index: 1, kind: input, shape index: {}, may-alias: {0,1}]   ;;  %s2559_s2 = inlined_call_operand.vmem [shape: bf16[4,32,8], index: 2, kind: input, shape index: {}]   ;;  %s2560_s3 = inlined_call_operand.vmem [shape: f32[4,1,8], index: 3, kind: input, shape index: {}]   ;;  %s2561_s4 = inlined_call_operand.vmem [shape: bf16[8,32,8], index: 4, kind: input, shape index: {}]   ;;  %s2562_s5 = inlined_call_operand.vmem [shape: f32[8,1,8], index: 5, kind: input, shape index: {}]   ;;  %s2563_s6 = inlined_call_operand.vmem [shape: bf16[32,32], index: 6, kind: input, shape index: {}]   ;;  %s2564_s7 = inlined_call_operand.vmem [shape: f32[1,32], index: 7, kind: input, shape index: {}, may-alias: {7,9}]   ;;  %s2565_s8 = inlined_call_operand.vmem [shape: f32[1,32], index: 8, kind: input, shape index: {}]   ;;  %s2566_s9 = inlined_call_operand.vmem [shape: f32[1,32], index: 9, kind: input, shape index: {}, may-alias: {7,9}]   ;;  %s2567_s10 = inlined_call_operand.vmem [shape: bf16[2,8,32], index: 10, kind: output, shape index: {}]  }
   0x1   :  { %s2266_s15 = smov 0  }
   0x2 LB: > { %s32_s16 = sadd.s32 1, %s2196_s14  ;;  %p1830_p0 = scmp.ge.s32.totalorder %s2200_s15, 1  ;;  %s2200_s15 = sphi %s2266_s15, %s20_s15   ;;  %s2196_s14 = sphi %s2264_s14, %s2569_s14   ;;  %s2192_s13 = sphi %s2262_s13, %s2568_s13  }
   0x3   : > { %p34_p1 = scmp.ge.s32.totalorder %s32_s16, 2  ;;  %p339_p2 = scmp.lt.s32.totalorder %s2200_s15, 3 }
   0x5   : > { %s2571_s16 = smov (%p34_p1, %s32_s16), 0  ;;  %p340_p3 = pnand %p1830_p0, %p339_p2 }
   0x6   : > { %v2134_v0 = vld [vmem:[%s2561_s4] sm:$0xff] (!%p340_p3)   ;;  %v2202_v1 = vmov (!%p340_p3), 0.0   ;;  %v2135_v2 = vld [vmem:[%s2561_s4 + $0x10] sm:$0xff] (!%p340_p3)   ;;  %v2136_v3 = vld [vmem:[%s2561_s4 + $0x8] sm:$0xff] (!%p340_p3)   ;;  %vm2203_vm0 = vmmov (!%p340_p3), 0   ;;  %p385_p4 = scmp.lt.s32.totalorder (!%p340_p3), %s2192_s13, 1 }
   0x7   : > { %343 = sbr.rel (%p340_p3) target bundleno = 1668 (0x684), region = 60  ;;  %1953 = vmatprep.subr.bf16.mxu0 (!%p340_p3), %v2202_v1  ;;  %1961 = vmatprep.subr.bf16.mxu1 (!%p340_p3), %v2202_v1  ;;  %v2137_v4 = vld [vmem:[%s2561_s4 + $0x18] sm:$0xff] (!%p340_p3)   ;;  %vm510_vm1 = vcmask (!%p340_p3), 261120   ;;  %v2138_v5 = vld [vmem:[%s2561_s4 + $0x20] sm:$0xff] (!%p340_p3)   ;;  %v2139_v6 = vld [vmem:[%s2561_s4 + $0x30] sm:$0xff] (!%p340_p3)   ;;  %vm922_vm2 = vcmask (!%p340_p3), 60416  }
   0x8   : > { %1954 = vmatpush3.bf16.msra.mxu0 (!%p340_p3), %v2134_v0  ;;  %1957 = vmatprep.mubr.msk.bf16.mxu0 (!%p340_p3), %vm2203_vm0, %v2202_v1  ;;  %v2140_v8 = vld [vmem:[%s2561_s4 + $0x28] sm:$0xff] (!%p340_p3)   ;;  %v2141_v9 = vld [vmem:[%s2561_s4 + $0x38] sm:$0xff] (!%p340_p3)   ;;  %v2142_v10 = vld [vmem:[%s2561_s4 + $0x40] sm:$0xff] (!%p340_p3)   ;;  %vm1203_vm3 = vcmask (!%p340_p3), 64512   ;;  %vm1439_vm4 = vcmask (!%p340_p3), 1043456   ;;  %s2204_s19 = smov (!%p340_p3), 8  }
   0x9   : > { %1962 = vmatpush3.bf16.msra.mxu1 (!%p340_p3), %v2135_v2  ;;  %1955 = vmatprep.subr.bf16.mxu0 (!%p340_p3), %v2202_v1  ;;  %v2143_v11 = vld [vmem:[%s2561_s4 + $0x50] sm:$0xff] (!%p340_p3)   ;;  %v2144_v12 = vld [vmem:[%s2561_s4 + $0x48] sm:$0xff] (!%p340_p3)   ;;  %v2145_v13 = vld [vmem:[%s2561_s4 + $0x58] sm:$0xff] (!%p340_p3)   ;;  %s2205_s20 = smov (!%p340_p3), 16   ;;  %s2206_s21 = smov (!%p340_p3), 24   ;;  %vm1634_vm5 = vcmask (!%p340_p3), 130048  }
   0xa   : > { %1963 = vmatprep.subr.bf16.mxu1 (!%p340_p3), %v2202_v1  ;;  %1965 = vmatprep.mubr.msk.bf16.mxu1 (!%p340_p3), %vm2203_vm0, %v2202_v1  ;;  %v2146_v14 = vld [vmem:[%s2561_s4 + $0x60] sm:$0xff] (!%p340_p3)   ;;  %v2147_v15 = vld [vmem:[%s2561_s4 + $0x70] sm:$0xff] (!%p340_p3)   ;;  %v2148_v16 = vld [vmem:[%s2561_s4 + $0x68] sm:$0xff] (!%p340_p3)   ;;  %vm1636_vm6 = vcmask (!%p340_p3), 195584   ;;  %vm1738_vm7 = vcmask (!%p340_p3), 257024  }
   0xb   : > { %v2149_v17 = vld [vmem:[%s2561_s4 + $0x78] sm:$0xff] (!%p340_p3)   ;;  %v2150_v18 = vld [vmem:[%s2559_s2] sm:$0xff] (!%p340_p3)   ;;  %v2151_v19 = vld [vmem:[%s2559_s2 + $0x10] sm:$0xff] (!%p340_p3)  }
   0xc   : > { %1956 = vmatpush3.bf16.msra.mxu0 (!%p340_p3), %v2136_v3  ;;  %v2152_v20 = vld [vmem:[%s2559_s2 + $0x8] sm:$0xff] (!%p340_p3)   ;;  %v2153_v21 = vld [vmem:[%s2559_s2 + $0x18] sm:$0xff] (!%p340_p3)   ;;  %v2154_v23 = vld [vmem:[%s2559_s2 + $0x20] sm:$0xff] (!%p340_p3)  }
   0xd   : > { %1964 = vmatpush3.bf16.msra.mxu1 (!%p340_p3), %v2137_v4  ;;  %1969 = vmatprep.subr.bf16.mxu0 (!%p340_p3), %v2202_v1  ;;  %v2155_v24 = vld [vmem:[%s2559_s2 + $0x30] sm:$0xff] (!%p340_p3)   ;;  %v2156_v25 = vld [vmem:[%s2559_s2 + $0x28] sm:$0xff] (!%p340_p3)   ;;  %v2157_v26 = vld [vmem:[%s2559_s2 + $0x38] sm:$0xff] (!%p340_p3)  }
   0xe   : > { %s2573_s13 = smov (!%p385_p4, %s2192_s13), 1  ;;  %1977 = vmatprep.subr.bf16.mxu1 %v2202_v1  ;;  %v1834_v27 = vld [vmem:[%s2562_s5] ss:$0 sm:$0xff]  ;;  %v1835_v28 = vld [vmem:[%s2562_s5 + $0x1] ss:$0 sm:$0xff] }
   0xf   : > { %s2300_s25 = sshll.u32 %s2573_s13, 2  ;;  %v1836_v41 = vld [vmem:[%s2562_s5 + $0x2] ss:$0 sm:$0xff]  ;;  %v1837_v42 = vld [vmem:[%s2562_s5 + $0x3] ss:$0 sm:$0xff] }
  0x10   : > { %s395_s30 = scalar_lea.vmem %s2558_s1, %s2300_s25  ;;  %s391_s11 = scalar_lea.vmem %s2557_s0, %s2300_s25  ;;  %v1838_v58 = vld [vmem:[%s2562_s5 + $0x4] ss:$0 sm:$0xff]  ;;  %v1839_v60 = vld [vmem:[%s2562_s5 + $0x5] ss:$0 sm:$0xff] }
  0x11   : > { %v409_v7 = vld [vmem:[%s395_s30] sm:$0xf] }
  0x12   : > { %1958 = vmatmul.mubr.msk.bf16.vlgmr.msra.gmra.mrb[0].mxu0 %vm510_vm1, %v409_v7  ;;  %1966 = vmatmul.mubr.msk.bf16.vlgmr.msra.gmra.mrb[0].mxu1 %vm510_vm1, %v409_v7  ;;  %v2398_v22 = vld [vmem:[%s391_s11] sm:$0xf]  ;;  %s402_s11 = scalar_lea.vmem %s2567_s10, %s2300_s25 }
  0x13   : > { %1970 = vmatpush3.bf16.msra.mxu0 %v2138_v5  ;;  %1978 = vmatpush3.bf16.msra.mxu1 %v2139_v6 }
  0x14   : > { %1971 = vmatprep.subr.bf16.mxu0 %v2202_v1  ;;  %1979 = vmatprep.subr.bf16.mxu1 %v2202_v1 }
  0x15   : > { %1973 = vmatprep.mubr.msk.bf16.mxu0 %vm2203_vm0, %v2202_v1  ;;  %1981 = vmatprep.mubr.msk.bf16.mxu1 %vm2203_vm0, %v2202_v1 }
  0x17   : > { %1972 = vmatpush3.bf16.msra.mxu0 %v2140_v8  ;;  %1980 = vmatpush3.bf16.msra.mxu1 %v2141_v9 }
  0x18   : > { %1985 = vmatprep.subr.bf16.mxu0 %v2202_v1  ;;  %1993 = vmatprep.subr.bf16.mxu1 %v2202_v1 }
  0x1a   : > { %1974 = vmatmul.mubr.msk.bf16.vlgmr.msra.gmra.mrb[4].mxu0 %vm510_vm1, %v409_v7  ;;  %1982 = vmatmul.mubr.msk.bf16.vlgmr.msra.gmra.mrb[4].mxu1 %vm510_vm1, %v409_v7 }
  0x1b   : > { %1986 = vmatpush3.bf16.msra.mxu0 %v2142_v10  ;;  %1994 = vmatpush3.bf16.msra.mxu1 %v2143_v11  ;;  %v1840_v10 = vld [vmem:[%s2562_s5 + $0x6] ss:$0 sm:$0xff]  ;;  %v1841_v11 = vld [vmem:[%s2562_s5 + $0x7] ss:$0 sm:$0xff] }
  0x1c   : > { %1987 = vmatprep.subr.bf16.mxu0 %v2202_v1  ;;  %1995 = vmatprep.subr.bf16.mxu1 %v2202_v1 }
  0x1d   : > { %1989 = vmatprep.mubr.msk.bf16.mxu0 %vm2203_vm0, %v2202_v1  ;;  %1997 = vmatprep.mubr.msk.bf16.mxu1 %vm2203_vm0, %v2202_v1 }
  0x1f   : > { %1988 = vmatpush3.bf16.msra.mxu0 %v2144_v12  ;;  %1996 = vmatpush3.bf16.msra.mxu1 %v2145_v13 }
  0x20   : > { %2001 = vmatprep.subr.bf16.mxu0 %v2202_v1  ;;  %2009 = vmatprep.subr.bf16.mxu1 %v2202_v1 }
  0x22   : > { %1990 = vmatmul.mubr.msk.bf16.vlgmr.msra.gmra.mrb[8].mxu0 %vm510_vm1, %v409_v7  ;;  %1998 = vmatmul.mubr.msk.bf16.vlgmr.msra.gmra.mrb[8].mxu1 %vm510_vm1, %v409_v7 }
  0x23   : > { %2002 = vmatpush3.bf16.msra.mxu0 %v2146_v14  ;;  %2010 = vmatpush3.bf16.msra.mxu1 %v2147_v15 }
  0x24   : > { %2003 = vmatprep.subr.bf16.mxu0 %v2202_v1  ;;  %2011 = vmatprep.subr.bf16.mxu1 %v2202_v1 }
  0x25   : > { %2005 = vmatprep.mubr.msk.bf16.mxu0 %vm2203_vm0, %v2202_v1  ;;  %2013 = vmatprep.mubr.msk.bf16.mxu1 %vm2203_vm0, %v2202_v1 }
  0x27   : > { %2004 = vmatpush3.bf16.msra.mxu0 %v2148_v16  ;;  %2012 = vmatpush3.bf16.msra.mxu1 %v2149_v17 }
  0x28   : > { %2017 = vmatprep.subr.bf16.mxu0 %v2202_v1  ;;  %2025 = vmatprep.subr.bf16.mxu1 %v2202_v1 }
  0x2a   : > { %2006 = vmatmul.mubr.msk.bf16.vlgmr.msra.gmra.mrb[12].mxu0 %vm510_vm1, %v409_v7  ;;  %2014 = vmatmul.mubr.msk.bf16.vlgmr.msra.gmra.mrb[12].mxu1 %vm510_vm1, %v409_v7 }
  0x2b   : > { %2018 = vmatpush3.bf16.msra.mxu0 %v2150_v18  ;;  %2026 = vmatpush3.bf16.msra.mxu1 %v2151_v19 }
  0x2c   : > { %2019 = vmatprep.subr.bf16.mxu0 %v2202_v1  ;;  %2027 = vmatprep.subr.bf16.mxu1 %v2202_v1 }
  0x2d   : > { %2021 = vmatprep.mubr.msk.bf16.mxu0 %vm2203_vm0, %v2202_v1  ;;  %2029 = vmatprep.mubr.msk.bf16.mxu1 %vm2203_vm0, %v2202_v1 }
  0x2f   : > { %2020 = vmatpush3.bf16.msra.mxu0 %v2152_v20  ;;  %2028 = vmatpush3.bf16.msra.mxu1 %v2153_v21 }
  0x30   : > { %2033 = vmatprep.subr.bf16.mxu0 %v2202_v1  ;;  %2041 = vmatprep.subr.bf16.mxu1 %v2202_v1 }
  0x32   : > { %2022 = vmatmul.mubr.msk.bf16.vlgmr.msra.gmra.mrb[16].mxu0 %vm510_vm1, %v2398_v22  ;;  %2030 = vmatmul.mubr.msk.bf16.vlgmr.msra.gmra.mrb[16].mxu1 %vm510_vm1, %v2398_v22 }
  0x33   : > { %2034 = vmatpush3.bf16.msra.mxu0 %v2154_v23  ;;  %2042 = vmatpush3.bf16.msra.mxu1 %v2155_v24 }
  0x34   : > { %2035 = vmatprep.subr.bf16.mxu0 %v2202_v1  ;;  %2043 = vmatprep.subr.bf16.mxu1 %v2202_v1 }
  0x35   : > { %2037 = vmatprep.mubr.msk.bf16.mxu0 %vm2203_vm0, %v2202_v1  ;;  %2045 = vmatprep.mubr.msk.bf16.mxu1 %vm2203_vm0, %v2202_v1 }
  0x37   : > { %2036 = vmatpush3.bf16.msra.mxu0 %v2156_v25  ;;  %2044 = vmatpush3.bf16.msra.mxu1 %v2157_v26  ;;  %v1866_v25 = vld [vmem:[%s2560_s3] ss:$0 sm:$0xff]  ;;  %v1867_v26 = vld [vmem:[%s2560_s3 + $0x1] ss:$0 sm:$0xff] }
  0x38   : > { %2049 = vmatprep.subr.bf16.mxu0 %v2202_v1  ;;  %2055 = vmatprep.subr.bf16.mxu1 %v2202_v1 }
  0x3a   : > { %2038 = vmatmul.mubr.msk.bf16.vlgmr.msra.gmra.mrb[20].mxu0 %vm510_vm1, %v2398_v22  ;;  %2046 = vmatmul.mubr.msk.bf16.vlgmr.msra.gmra.mrb[20].mxu1 %vm510_vm1, %v2398_v22 }
  0x3b   : > { %2051 = vmatprep.mubr.msk.bf16.mxu0 %vm2203_vm0, %v2202_v1  ;;  %2057 = vmatprep.mubr.msk.bf16.mxu1 %vm2203_vm0, %v2202_v1 }
  0xe5   : > { %v548_v29 = vpop.f32.mrb[0].mxu0  ;;  %v600_v32 = vpop.f32.mrb[0].mxu1 }
  0xe6   : > { %v549_v30 = vadd.f32 %v1834_v27, %v548_v29  ;;  %v1959_v31 = vpop.f32.mrb[1].mxu0  ;;  %v601_v34 = vadd.f32 %v1835_v28, %v600_v32  ;;  %v1967_v35 = vpop.f32.mrb[1].mxu1 }
  0xe7   : > { %v551_v33 = vpop.f32.mrb[2].mxu0  ;;  %v603_v38 = vpop.f32.mrb[2].mxu1 }
  0xe8   : > { %v918_v36 = vpack.c.bf16 %v549_v30, %v549_v30  ;;  %v1960_v37 = vpop.f32.mrb[3].mxu0  ;;  %v919_v39 = vpack.c.bf16 %v601_v34, %v601_v34  ;;  %v1968_v40 = vpop.f32.mrb[3].mxu1 }
  0xea   : > { %923 = vst.msk [vmem:[#allocation2] sm:$0xf] %vm922_vm2, %v918_v36  ;;  %924 = vst.msk [vmem:[#allocation2 + $0x4] sm:$0xf] %vm922_vm2, %v919_v39 }
  0xed   : > { %v652_v43 = vpop.f32.mrb[4].mxu0  ;;  %v704_v46 = vpop.f32.mrb[4].mxu1 }
  0xee   : > { %v653_v44 = vadd.f32 %v1836_v41, %v652_v43  ;;  %v1975_v45 = vpop.f32.mrb[5].mxu0  ;;  %v705_v48 = vadd.f32 %v1837_v42, %v704_v46  ;;  %v1983_v49 = vpop.f32.mrb[5].mxu1  ;;  %v1868_v43 = vld [vmem:[%s2560_s3 + $0x2] ss:$0 sm:$0xff] }
  0xef   : > { %v655_v47 = vpop.f32.mrb[6].mxu0  ;;  %v707_v52 = vpop.f32.mrb[6].mxu1 }
  0xf0   : > { %v920_v50 = vpack.c.bf16 %v653_v44, %v653_v44  ;;  %v1976_v51 = vpop.f32.mrb[7].mxu0  ;;  %v921_v53 = vpack.c.bf16 %v705_v48, %v705_v48  ;;  %v1984_v54 = vpop.f32.mrb[7].mxu1  ;;  %v1869_v44 = vld [vmem:[%s2560_s3 + $0x3] ss:$0 sm:$0xff] }
  0xf1   : > { %v1195_v55 = vld [vmem:[#allocation2] sm:$0xf]  ;;  %v1196_v57 = vld [vmem:[#allocation2 + $0x4] sm:$0xf] }
  0xf2   : > { %925 = vst.msk [vmem:[#allocation2 + $0x8] sm:$0xf] %vm922_vm2, %v920_v50  ;;  %v1208_v56 = vsel %vm1203_vm3, %v1195_v55, 0  ;;  %926 = vst.msk [vmem:[#allocation2 + $0xc] sm:$0xf] %vm922_vm2, %v921_v53  ;;  %v1254_v59 = vsel %vm1203_vm3, %v1196_v57, 0 }
  0xf3   : > { %2050 = vmatpush3.bf16.xpose.msra.mxu0 %v1208_v56  ;;  %2056 = vmatpush3.bf16.xpose.msra.mxu1 %v1254_v59 }
  0xf4   : > { %2061 = vmatprep.subr.bf16.mxu0 %v2202_v1  ;;  %2067 = vmatprep.subr.bf16.mxu1 %v2202_v1 }
  0xf5   : > { %v756_v61 = vpop.f32.mrb[8].mxu0  ;;  %v808_v0 = vpop.f32.mrb[8].mxu1 }
  0xf6   : > { %v757_v62 = vadd.f32 %v1838_v58, %v756_v61  ;;  %v1991_v63 = vpop.f32.mrb[9].mxu0  ;;  %v809_v3 = vadd.f32 %v1839_v60, %v808_v0  ;;  %v1999_v4 = vpop.f32.mrb[9].mxu1 }
  0xf7   : > { %v759_v2 = vpop.f32.mrb[10].mxu0  ;;  %v811_v7 = vpop.f32.mrb[10].mxu1 }
  0xf8   : > { %v927_v5 = vpack.c.bf16 %v757_v62, %v757_v62  ;;  %v1992_v6 = vpop.f32.mrb[11].mxu0  ;;  %v928_v8 = vpack.c.bf16 %v809_v3, %v809_v3  ;;  %v2000_v9 = vpop.f32.mrb[11].mxu1 }
  0xf9   : > { %v1197_v34 = vld [vmem:[#allocation2 + $0x8] sm:$0xf]  ;;  %v1198_v38 = vld [vmem:[#allocation2 + $0xc] sm:$0xf] }
  0xfa   : > { %931 = vst.msk [vmem:[#allocation3] sm:$0xf] %vm922_vm2, %v927_v5  ;;  %932 = vst.msk [vmem:[#allocation3 + $0x4] sm:$0xf] %vm922_vm2, %v928_v8  ;;  %v1300_v41 = vsel %vm1203_vm3, %v1197_v34, 0  ;;  %v1346_v42 = vsel %vm1203_vm3, %v1198_v38, 0 }
  0xfd   : > { %v860_v12 = vpop.f32.mrb[12].mxu0  ;;  %v912_v15 = vpop.f32.mrb[12].mxu1 }
  0xfe   : > { %v861_v13 = vadd.f32 %v1840_v10, %v860_v12  ;;  %v2007_v14 = vpop.f32.mrb[13].mxu0  ;;  %v913_v17 = vadd.f32 %v1841_v11, %v912_v15  ;;  %v2015_v18 = vpop.f32.mrb[13].mxu1 }
  0xff   : > { %v863_v16 = vpop.f32.mrb[14].mxu0  ;;  %v915_v21 = vpop.f32.mrb[14].mxu1 }
 0x100   : > { %v929_v19 = vpack.c.bf16 %v861_v13, %v861_v13  ;;  %v2008_v20 = vpop.f32.mrb[15].mxu0  ;;  %v930_v23 = vpack.c.bf16 %v913_v17, %v913_v17  ;;  %v2016_v24 = vpop.f32.mrb[15].mxu1 }
 0x101   : > { %v1199_v52 = vld [vmem:[#allocation3] sm:$0xf]  ;;  %v1200_v56 = vld [vmem:[#allocation3 + $0x4] sm:$0xf] }
 0x102   : > { %933 = vst.msk [vmem:[#allocation3 + $0x8] sm:$0xf] %vm922_vm2, %v929_v19  ;;  %934 = vst.msk [vmem:[#allocation3 + $0xc] sm:$0xf] %vm922_vm2, %v930_v23  ;;  %v1441_v59 = vsel %vm1439_vm4, %v1199_v52, 0  ;;  %v1487_v60 = vsel %vm1439_vm4, %v1200_v56, 0 }
 0x105   : > { %v1029_v27 = vpop.f32.mrb[16].mxu0  ;;  %v1081_v29 = vpop.f32.mrb[16].mxu1 }
 0x106   : > { %v1030_v28 = vadd.f32 %v1866_v25, %v1029_v27  ;;  %v2023_v30 = vpop.f32.mrb[17].mxu0  ;;  %v1082_v31 = vadd.f32 %v1867_v26, %v1081_v29  ;;  %v2031_v33 = vpop.f32.mrb[17].mxu1 }
 0x107   : > { %v1032_v32 = vpop.f32.mrb[18].mxu0  ;;  %v1084_v37 = vpop.f32.mrb[18].mxu1 }
 0x108   : > { %v1191_v35 = vpack.c.bf16 %v1030_v28, %v1030_v28  ;;  %v2024_v36 = vpop.f32.mrb[19].mxu0  ;;  %v1192_v39 = vpack.c.bf16 %v1082_v31, %v1082_v31  ;;  %v2032_v40 = vpop.f32.mrb[19].mxu1 }
 0x10a   : > { %2052 = vmatmul.mubr.msk.bf16.vlgmr.msra.gmra.mrb[24].mxu0 %vm1203_vm3, %v1191_v35  ;;  %2058 = vmatmul.mubr.msk.bf16.vlgmr.msra.gmra.mrb[24].mxu1 %vm1203_vm3, %v1192_v39 }
 0x10b   : > { %2062 = vmatpush3.bf16.xpose.msra.mxu0 %v1300_v41  ;;  %2068 = vmatpush3.bf16.xpose.msra.mxu1 %v1346_v42 }
 0x10c   : > { %2063 = vmatprep.mubr.msk.bf16.mxu0 %vm2203_vm0, %v2202_v1  ;;  %2069 = vmatprep.mubr.msk.bf16.mxu1 %vm2203_vm0, %v2202_v1 }
 0x10d   : > { %v1133_v45 = vpop.f32.mrb[20].mxu0  ;;  %2073 = vmatprep.subr.bf16.mxu0 %v2202_v1  ;;  %v1185_v47 = vpop.f32.mrb[20].mxu1  ;;  %2079 = vmatprep.subr.bf16.mxu1 %v2202_v1 }
 0x10e   : > { %v1134_v46 = vadd.f32 %v1868_v43, %v1133_v45  ;;  %v2039_v48 = vpop.f32.mrb[21].mxu0  ;;  %v1186_v49 = vadd.f32 %v1869_v44, %v1185_v47  ;;  %v2047_v51 = vpop.f32.mrb[21].mxu1  ;;  %v1201_v45 = vld [vmem:[#allocation3 + $0x8] sm:$0xf] }
 0x10f   : > { %v1136_v50 = vpop.f32.mrb[22].mxu0  ;;  %v1188_v55 = vpop.f32.mrb[22].mxu1 }
 0x110   : > { %v1193_v53 = vpack.c.bf16 %v1134_v46, %v1134_v46  ;;  %v2040_v54 = vpop.f32.mrb[23].mxu0  ;;  %v1194_v57 = vpack.c.bf16 %v1186_v49, %v1186_v49  ;;  %v2048_v58 = vpop.f32.mrb[23].mxu1  ;;  %v1533_v49 = vsel %vm1439_vm4, %v1201_v45, 0  ;;  %v1202_v50 = vld [vmem:[#allocation3 + $0xc] sm:$0xf] }
 0x111   : > { %v1579_v54 = vsel %vm1439_vm4, %v1202_v50, 0 }
 0x112   : > { %2064 = vmatmul.mubr.msk.bf16.vlgmr.msra.gmra.mrb[28].mxu0 %vm1203_vm3, %v1193_v53  ;;  %2070 = vmatmul.mubr.msk.bf16.vlgmr.msra.gmra.mrb[28].mxu1 %vm1203_vm3, %v1194_v57 }
 0x113   : > { %2074 = vmatpush3.bf16.msra.mxu0 %v1441_v59  ;;  %2080 = vmatpush3.bf16.msra.mxu1 %v1487_v60  ;;  %v2158_v59 = vld [vmem:[%s2563_s6] sm:$0xff]  }
 0x114   : > { %2075 = vmatprep.mubr.msk.bf16.mxu0 %vm2203_vm0, %v2202_v1  ;;  %2085 = vmatprep.subr.bf16.mxu0 %v2202_v1 }
 0x115   : > { %2081 = vmatprep.mubr.msk.bf16.mxu1 %vm2203_vm0, %v2202_v1  ;;  %2091 = vmatprep.subr.bf16.mxu1 %v2202_v1 }
 0x1dd   : > { %v1244_v61 = vpop.f32.mrb[24].mxu0  ;;  %v1290_v63 = vpop.f32.mrb[24].mxu1 }
 0x1de   : > { %v2053_v62 = vpop.f32.mrb[25].mxu0  ;;  %v1388_v0 = vsel %vm1203_vm3, %v1244_v61, -inf  ;;  %v2059_v3 = vpop.f32.mrb[25].mxu1  ;;  %v1391_v6 = vsel %vm1203_vm3, %v1290_v63, -inf }
 0x1df   : > { %1389 = vmax.xlane.f32.xlu0 %v1388_v0  ;;  %v1247_v2 = vpop.f32.mrb[26].mxu0  ;;  %v1293_v5 = vpop.f32.mrb[26].mxu1 }
 0x1e0   : > { %v2054_v4 = vpop.f32.mrb[27].mxu0  ;;  %v2060_v7 = vpop.f32.mrb[27].mxu1 }
 0x1e3   : > { %1392 = vmax.xlane.f32.xlu0 %v1391_v6 }
 0x1e5   : > { %v1336_v8 = vpop.f32.mrb[28].mxu0  ;;  %v1382_v10 = vpop.f32.mrb[28].mxu1 }
 0x1e6   : > { %v2065_v9 = vpop.f32.mrb[29].mxu0  ;;  %v1394_v11 = vsel %vm1203_vm3, %v1336_v8, -inf  ;;  %v2071_v13 = vpop.f32.mrb[29].mxu1  ;;  %v1397_v16 = vsel %vm1203_vm3, %v1382_v10, -inf }
 0x1e7   : > { %1395 = vmax.xlane.f32.xlu1 %v1394_v11  ;;  %v1339_v12 = vpop.f32.mrb[30].mxu0  ;;  %v1385_v15 = vpop.f32.mrb[30].mxu1 }
 0x1e8   : > { %v2066_v14 = vpop.f32.mrb[31].mxu0  ;;  %v2072_v17 = vpop.f32.mrb[31].mxu1 }
 0x1eb   : > { %1398 = vmax.xlane.f32.xlu1 %v1397_v16 }
 0x26c   : > { %v1390_v18 = vpop.xlane.xlu0 %1389 }
 0x26d   : > { %v1400_v19 = vsub.f32 %v1244_v61, %v1390_v18  ;;  %v2159_v61 = vld [vmem:[%s2563_s6 + $0x8] sm:$0xff]  }
 0x26f   : > { %v1404_v20 = vmul.f32 1.442695, %v1400_v19 }
 0x270   : > { %v1393_v21 = vpop.xlane.xlu0 %1392 }
 0x271   : > { %2160 = vpow2.f32 %v1404_v20  ;;  %v1401_v23 = vsub.f32 %v1290_v63, %v1393_v21  ;;  %v1890_v20 = vld [vmem:[%s2564_s7] ss:$0 sm:$0xff]  ;;  %v1705_v21 = vunpack.c.l.bf16 %v2398_v22 }
 0x273   : > { %v1406_v24 = vmul.f32 1.442695, %v1401_v23 }
 0x274   : > { %v1396_v25 = vpop.xlane.xlu1 %1395 }
 0x275   : > { %2162 = vpow2.f32 %v1406_v24  ;;  %v1402_v26 = vsub.f32 %v1336_v8, %v1396_v25 }
 0x277   : > { %v1408_v27 = vmul.f32 1.442695, %v1402_v26 }
 0x278   : > { %v1399_v28 = vpop.xlane.xlu1 %1398 }
 0x279   : > { %2164 = vpow2.f32 %v1408_v27  ;;  %v1403_v29 = vsub.f32 %v1382_v10, %v1399_v28 }
 0x27b   : > { %v2161_v30 = vpop.eup %2160  ;;  %v1410_v31 = vmul.f32 1.442695, %v1403_v29 }
 0x27c   : > { %v1412_v32 = vsel %vm1203_vm3, %v2161_v30, 0.0 }
 0x27d   : > { %2166 = vpow2.f32 %v1410_v31  ;;  %1413 = vadd.xlane.f32.xlu0 %v1412_v32 }
 0x27f   : > { %v2163_v33 = vpop.eup %2162 }
 0x280   : > { %v1415_v34 = vsel %vm1203_vm3, %v2163_v33, 0.0 }
 0x281   : > { %1416 = vadd.xlane.f32.xlu1 %v1415_v34 }
 0x283   : > { %v2165_v35 = vpop.eup %2164 }
 0x284   : > { %v1418_v36 = vsel %vm1203_vm3, %v2165_v35, 0.0 }
 0x285   : > { %1419 = vadd.xlane.f32.xlu0 %v1418_v36 }
 0x287   : > { %v2167_v37 = vpop.eup %2166 }
 0x288   : > { %v1421_v38 = vsel %vm1203_vm3, %v2167_v37, 0.0 }
 0x289   : > { %1422 = vadd.xlane.f32.xlu1 %v1421_v38  ;;  %v1894_v38 = vld [vmem:[%s2565_s8] ss:$0 sm:$0xff] }
 0x30a   : > { %v1414_v39 = vpop.xlane.xlu0 %1413 }
 0x30b   : > { %2168 = vrcp.f32 %v1414_v39 }
 0x30e   : > { %v1417_v40 = vpop.xlane.xlu1 %1416 }
 0x30f   : > { %2170 = vrcp.f32 %v1417_v40  ;;  %v1895_v40 = vld [vmem:[%s2566_s9] ss:$0 sm:$0xff] }
 0x312   : > { %v1420_v41 = vpop.xlane.xlu0 %1419 }
 0x313   : > { %2172 = vrcp.f32 %v1420_v41 }
 0x315   : > { %v2169_v42 = vpop.eup %2168 }
 0x316   : > { %v1428_v43 = vmul.f32 %v2169_v42, %v2161_v30  ;;  %v1423_v44 = vpop.xlane.xlu1 %1422 }
 0x317   : > { %2174 = vrcp.f32 %v1423_v44 }
 0x318   : > { %v1432_v46 = vpack.c.bf16 %v1428_v43, %v1428_v43 }
 0x319   : > { %v2171_v47 = vpop.eup %2170 }
 0x31a   : > { %v1429_v48 = vmul.f32 %v2171_v47, %v2163_v33  ;;  %2076 = vmatmul.mubr.msk.bf16.vlgmr.msra.gmra.mrb[32].mxu0 %vm1203_vm3, %v1432_v46 }
 0x31b   : > { %2086 = vmatpush3.bf16.msra.mxu0 %v1533_v49  ;;  %2087 = vmatprep.mubr.msk.bf16.mxu0 %vm2203_vm0, %v2202_v1 }
 0x31c   : > { %v1433_v51 = vpack.c.bf16 %v1429_v48, %v1429_v48  ;;  %2097 = vmatprep.subr.bf16.mxu0 %v2202_v1 }
 0x31d   : > { %v2173_v52 = vpop.eup %2172 }
 0x31e   : > { %v1430_v53 = vmul.f32 %v2173_v52, %v2165_v35  ;;  %2082 = vmatmul.mubr.msk.bf16.vlgmr.msra.gmra.mrb[32].mxu1 %vm1203_vm3, %v1433_v51 }
 0x31f   : > { %2092 = vmatpush3.bf16.msra.mxu1 %v1579_v54  ;;  %2093 = vmatprep.mubr.msk.bf16.mxu1 %vm2203_vm0, %v2202_v1 }
 0x320   : > { %v1434_v55 = vpack.c.bf16 %v1430_v53, %v1430_v53 }
 0x321   : > { %v2175_v56 = vpop.eup %2174 }
 0x322   : > { %v1431_v57 = vmul.f32 %v2175_v56, %v2167_v37  ;;  %2088 = vmatmul.mubr.msk.bf16.vlgmr.msra.gmra.mrb[36].mxu0 %vm1203_vm3, %v1434_v55 }
 0x323   : > { %2101 = vmatprep.mubr.msk.bf16.mxu0 %vm2203_vm0, %v2202_v1  ;;  %2098 = vmatpush3.bf16.msra.mxu0 %v2158_v59 }
 0x324   : > { %v1435_v58 = vpack.c.bf16 %v1431_v57, %v1431_v57  ;;  %2099 = vmatprep.subr.bf16.mxu0 %v2202_v1 }
 0x326   : > { %2094 = vmatmul.mubr.msk.bf16.vlgmr.msra.gmra.mrb[36].mxu1 %vm1203_vm3, %v1435_v58 }
 0x327   : > { %2100 = vmatpush3.bf16.msra.mxu0 %v2159_v61 }
 0x3ed   : > { %v1477_v60 = vpop.f32.mrb[32].mxu0 }
 0x3ee   : > { %v2077_v62 = vpop.f32.mrb[33].mxu0 }
 0x3ef   : > { %v1480_v63 = vpop.f32.mrb[34].mxu0 }
 0x3f0   : > { %v2078_v0 = vpop.f32.mrb[35].mxu0 }
 0x3f1   : > { %v1523_v2 = vpop.f32.mrb[32].mxu1 }
 0x3f2   : > { %1622 = vrot.lane.b32.xlu0 %v1523_v2, %s2204_s19  ;;  %v2083_v3 = vpop.f32.mrb[33].mxu1 }
 0x3f3   : > { %v1526_v4 = vpop.f32.mrb[34].mxu1 }
 0x3f4   : > { %v2084_v5 = vpop.f32.mrb[35].mxu1 }
 0x3f5   : > { %v1569_v6 = vpop.f32.mrb[36].mxu0 }
 0x3f6   : > { %1626 = vrot.lane.b32.xlu1 %v1569_v6, %s2205_s20  ;;  %v2089_v7 = vpop.f32.mrb[37].mxu0 }
 0x3f7   : > { %v1572_v1 = vpop.f32.mrb[38].mxu0 }
 0x3f8   : > { %v2090_v8 = vpop.f32.mrb[39].mxu0 }
 0x3f9   : > { %v1615_v9 = vpop.f32.mrb[36].mxu1 }
 0x3fa   : > { %v2095_v10 = vpop.f32.mrb[37].mxu1  ;;  %1630 = vrot.lane.b32.xlu1 %v1615_v9, %s2206_s21 }
 0x3fb   : > { %v1618_v11 = vpop.f32.mrb[38].mxu1 }
 0x3fc   : > { %v2096_v12 = vpop.f32.mrb[39].mxu1 }
 0x464   : > { %v1623_v13 = vpop.permute.xlu0 %1622 }
 0x465   : > { %v1633_v15 = vsel %vm1203_vm3, %v1477_v60, %v1623_v13 }
 0x468   : > { %v1627_v14 = vpop.permute.xlu1 %1626 }
 0x469   : > { %v1635_v16 = vsel %vm1634_vm5, %v1633_v15, %v1627_v14 }
 0x46c   : > { %v1631_v17 = vpop.permute.xlu1 %1630 }
 0x46d   : > { %v1637_v18 = vsel %vm1636_vm6, %v1635_v16, %v1631_v17 }
 0x46e   : > { %v1638_v19 = vpack.c.bf16 %v1637_v18, %v1637_v18 }
 0x470   : > { %2102 = vmatmul.mubr.msk.bf16.vlgmr.msra.gmra.mrb[40].mxu0 %vm510_vm1, %v1638_v19 }
 0x543   : > { %v1699_v23 = vpop.f32.mrb[40].mxu0 }
 0x544   : > { %v1700_v24 = vadd.f32 %v1890_v20, %v1699_v23  ;;  %v2103_v25 = vpop.f32.mrb[41].mxu0 }
 0x545   : > { %v1702_v26 = vpop.f32.mrb[42].mxu0 }
 0x546   : > { %v2104_v27 = vpop.f32.mrb[43].mxu0  ;;  %v1706_v28 = vadd.f32 %v1705_v21, %v1700_v24 }
 0x548   : > { %v1709_v29 = vsel %vm510_vm1, %v1706_v28, 0.0 }
 0x549   : > { %1710 = vadd.xlane.f32.xlu1 %v1709_v29 }
 0x5d6   : > { %v1711_v30 = vpop.xlane.xlu1 %1710 }
 0x5d7   : > { %v1713_v31 = vmul.f32 0.03125, %v1711_v30 }
 0x5d9   : > { %v1714_v32 = vsub.f32 %v1706_v28, %v1713_v31 }
 0x5db   : > { %v1715_v33 = vmul.f32 %v1714_v32, %v1714_v32 }
 0x5dd   : > { %v1716_v34 = vsel %vm510_vm1, %v1715_v33, 0.0 }
 0x5de   : > { %1717 = vadd.xlane.f32.xlu0 %v1716_v34 }
 0x66b   : > { %v1718_v35 = vpop.xlane.xlu0 %1717 }
 0x66c   : > { %v1719_v36 = vmul.f32 0.03125, %v1718_v35 }
 0x66e   : > { %v1720_v22 = vadd.f32 1e-05, %v1719_v36 }
 0x670   : > { %2176 = vrsqrt.f32 %v1720_v22 }
 0x67a   : > { %v2177_v37 = vpop.eup %2176 }
 0x67b   : > { %v1722_v39 = vmul.f32 %v2177_v37, %v1714_v32 }
 0x67d   : > { %v1729_v41 = vmul.f32 %v1894_v38, %v1722_v39 }
 0x67f   : > { %v1736_v42 = vadd.f32 %v1895_v40, %v1729_v41 }
 0x681   : > { %v1737_v43 = vpack.c.bf16 %v1736_v42, %v1736_v42 }
 0x683   : > { %1739 = vst.msk [vmem:[%s402_s11] sm:$0xf] %vm1738_vm7, %v1737_v43 }
 0x684 PF: > { %s20_s15 = sadd.s32 1, %s2200_s15   ;;  %s2568_s13 = smov %s2196_s14 }
 0x685   : > { %p17_p5 = scmp.ge.s32.totalorder %s20_s15, 4   ;;  %s2569_s14 = smov %s2571_s16 }
 0x687   :  { %19 = sbr.rel (!%p17_p5) target bundleno = 2 (0x2), region = 97 }

</bundles_post_ra>
